<compile_context>
chip_gen: v7x
topology: tpu7x:2x2x1
jax: 0.10.0
libtpu: 0.0.40
codegen_flags: <defaults>
</compile_context>

<pallas_src>
import math

import jax
import jax.numpy as jnp
from jax.experimental import pallas as pl
from jax.experimental.pallas import tpu as pltpu

BF16 = jnp.bfloat16


def _gelu_erf(x):
    # Exact erf-GELU (PyTorch's default 'gelu'); erf via Abramowitz-Stegun 7.1.26
    # (max abs error ~1.5e-7) so only exp / mul / add / select are needed in-kernel.
    xs = x * 0.7071067811865476
    ax = jnp.abs(xs)
    t = 1.0 / (1.0 + 0.3275911 * ax)
    poly = t * (0.254829592 + t * (-0.284496736 + t * (1.421413741
             + t * (-1.453152027 + t * 1.061405429))))
    erf_abs = 1.0 - poly * jnp.exp(-ax * ax)
    erf = jnp.where(xs >= 0.0, erf_abs, -erf_abs)
    return 0.5 * x * (1.0 + erf)


# ----------------------------------------------------------------------------- #
# Fused kernel
# ----------------------------------------------------------------------------- #
def make_fused_flow_kernel(*, B, T, C, D, S, H, hidden, num_layers):
    Dh = D // H
    inv_sqrt_dh = 1.0 / math.sqrt(Dh)
    inv_d = 1.0 / D
    sqrt2 = math.sqrt(2.0)

    def kernel(zt_ref, t_ref, cond_ref, mask_ref,
               freqs_ref, te_w1_ref, te_w2_ref, w_in_ref, w_out_ref,
               attn_w_ref, attn_b_ref, w1_ref, fb1_ref, w2_ref, fb2_ref, ln_ref,
               out_ref, x_acc, o_scr):
        b = pl.program_id(0)          # batch  ("parallel": split across TCs on v7x)
        l = pl.program_id(1)          # layer  ("arbitrary": sequential, x_acc resident)

        # ------------------ prologue (runs only at layer 0) ------------------ #
        @pl.when(l == 0)
        def _():
            t = t_ref[b, 0]                                         # scalar f32 (SMEM)
            # sinusoidal timestep embedding: cat([cos, sin]) then biasless SiLU MLP
            args = t * freqs_ref[...]                               # [1, F//2]
            emb = jnp.concatenate([jnp.cos(args), jnp.sin(args)], axis=-1)   # [1, F]
            h = jnp.dot(emb.astype(BF16), te_w1_ref[...],
                        preferred_element_type=jnp.float32)
            h = h * jax.nn.sigmoid(h)                               # SiLU (f32)
            t_emb = jnp.dot(h.astype(BF16), te_w2_ref[...],
                            preferred_element_type=jnp.float32)     # [1, D]

            # x = in_proj( (z / sqrt(t^2 + (1-t)^2)).permute(0, 2, 1) ) + t_emb
            # z arrives already as [B, T, C]; in_proj is one standard MXU matmul
            # (the former T x T identity-matmul transpose is removed).
            scale = jax.lax.rsqrt(t * t + (1.0 - t) * (1.0 - t))
            zb = zt_ref[0] * scale                                  # [T, C] f32
            xb = jnp.dot(zb.astype(BF16), w_in_ref[...],
                         preferred_element_type=jnp.float32)        # [T, D]
            # TODO(synk): exact per-layer timestep conditioning of StreamingTransformer
            # is unknown; t_emb is injected additively before the first layer.
            x_acc[...] = xb + t_emb

        # ------------------ one transformer layer per grid step -------------- #
        x = x_acc[...]                                              # [T, D] f32
        x_bf = x.astype(BF16)                                       # hoisted bf16 cast
        cond_bf = cond_ref[...].astype(BF16)                        # [S, D]
        mask_row = mask_ref[0]                                      # [1, S] (pre-clamped)

        def layer_norm(v, g, bb):
            # two-pass (subtract-mean) variance in f32
            mu = jnp.sum(v, axis=-1, keepdims=True) * inv_d
            d = v - mu
            var = jnp.sum(d * d, axis=-1, keepdims=True) * inv_d
            return d * jax.lax.rsqrt(var + 1e-5) * g + bb

        def ln_p(r):
            return ln_ref[0, r:r + 1, :]

        def mha(q_bf, kv_bf, Sk, off, bias_row):
            # Lazily slice this layer's weights out of the stacked block
            # (no full [8D, D] materialization).
            def w(i):
                return attn_w_ref[0, (off + i) * D:(off + i + 1) * D, :]

            def bias(i):
                return attn_b_ref[0, off + i:off + i + 1, :]

            q = jnp.dot(q_bf, w(0), preferred_element_type=jnp.float32) + bias(0)
            q = q * inv_sqrt_dh                                     # fold 1/sqrt(Dh) once
            k = jnp.dot(kv_bf, w(1), preferred_element_type=jnp.float32) + bias(1)
            v = jnp.dot(kv_bf, w(2), preferred_element_type=jnp.float32) + bias(2)
            q16 = q.astype(BF16)                                    # hoisted bf16 casts
            k16 = k.astype(BF16)
            v16 = v.astype(BF16)
            if bias_row is not None:                                # hoisted mask broadcast
                bias_full = jnp.broadcast_to(bias_row, (T, Sk))

            # Static unroll over heads (H small here).  Each head writes its output to
            # its contiguous column slice of o_scr; the output projection then runs
            # ONCE with full contraction depth K = D.
            # TODO(synk): for production H (>= 8-16) switch to lax.fori_loop with pl.ds
            # column slices to bound vreg live ranges.
            for hh in range(H):
                cs = slice(hh * Dh, (hh + 1) * Dh)
                s = jax.lax.dot_general(
                    q16[:, cs], k16[:, cs], (((1,), (1,)), ((), ())),
                    preferred_element_type=jnp.float32)             # [T, Sk]
                if bias_row is not None:
                    s = s + bias_full
                m = jnp.max(s, axis=-1, keepdims=True)
                p = jnp.exp(s - m)
                a = p * pl.reciprocal(jnp.sum(p, axis=-1, keepdims=True), approx=True)
                o_scr[:, cs] = jnp.dot(a.astype(BF16), v16[:, cs],
                                       preferred_element_type=jnp.float32)   # [T, Dh]
            return jnp.dot(o_scr[...].astype(BF16), w(3),
                           preferred_element_type=jnp.float32) + bias(3)      # [T, D]

        # post-norm layer (norm_first=False): x = norm(x + sublayer(x))
        h1 = layer_norm(x + mha(x_bf, x_bf, T, 0, None), ln_p(0), ln_p(1))
        h1_bf = h1.astype(BF16)
        h2 = layer_norm(h1 + mha(h1_bf, cond_bf, S, 4, mask_row), ln_p(2), ln_p(3))
        h2_bf = h2.astype(BF16)
        # TODO(synk): at production T/hidden, row-tile this FFN (and the attention q rows)
        # so peak VMEM scales with the tile, not with T*hidden (critical on v7x's 64 MiB).
        ff = jnp.dot(h2_bf, w1_ref[0], preferred_element_type=jnp.float32) + fb1_ref[0]
        ff = _gelu_erf(ff)
        ff = jnp.dot(ff.astype(BF16), w2_ref[0],
                     preferred_element_type=jnp.float32) + fb2_ref[0]
        x_new = layer_norm(h2 + ff, ln_p(4), ln_p(5))
        x_acc[...] = x_new

        # ------------------ epilogue (runs only at the last layer) ----------- #
        @pl.when(l == num_layers - 1)
        def _():
            # out_proj computed directly in channels-first [C, T] (rhs-transposed dot),
            # so the store is lane-dense on T and the wrapper needs no output permute.
            yb = jax.lax.dot_general(w_out_ref[...], x_new.astype(BF16),
                                     (((1,), (1,)), ((), ())),
                                     preferred_element_type=jnp.float32)    # [C, T]
            out_ref[0, :, :] = yb * sqrt2

    return kernel


# ----------------------------------------------------------------------------- #
# Parameters (synthetic, deterministic; std = 1/sqrt(fan_in) like get_init_fn)
# ----------------------------------------------------------------------------- #
def init_flow_params(key, *, latent_dim, dim, hidden, freq_dim, num_layers):
    D, L = dim, num_layers

    def lin(k, shape, fan_in):
        return (jax.random.normal(k, shape, jnp.float32) / math.sqrt(fan_in)).astype(BF16)

    keys = jax.random.split(key, 8)
    half = freq_dim // 2
    ln = jnp.zeros((L, 6, D), jnp.float32).at[:, 0::2, :].set(1.0)   # rows 0/2/4 gains, 1/3/5 biases
    return {
        'freqs': jnp.exp(-math.log(10000.0)
                         * jnp.arange(half, dtype=jnp.float32) / half)[None, :],   # [1, F//2] f32
        'te_w1': lin(keys[0], (freq_dim, D), freq_dim),              # timestep MLP (biasless)
        'te_w2': lin(keys[1], (D, D), D),
        'w_in': lin(keys[2], (latent_dim, D), latent_dim),           # [in, out], biasless
        'w_out': lin(keys[3], (latent_dim, D), D),                   # torch [out, in], biasless
        # per-layer weights stacked along L: rows = [self q,k,v,o, cross q,k,v,o] * D
        'attn_w': lin(keys[4], (L, 8 * D, D), D),
        'attn_b': 0.02 * jax.random.normal(keys[5], (L, 8, D), jnp.float32),
        'ffn_w1': lin(keys[6], (L, D, hidden), D),
        'ffn_b1': jnp.zeros((L, 1, hidden), jnp.float32),
        'ffn_w2': lin(keys[7], (L, hidden, D), hidden),
        'ffn_b2': jnp.zeros((L, 1, D), jnp.float32),
        'ln': ln,
    }


# ----------------------------------------------------------------------------- #
# Forward wrapper (one pallas_call)
# ----------------------------------------------------------------------------- #
def flow_model_forward(params, z, t, condition_src, condition_mask, *, num_heads):
    """z: [B, latent_dim, T] (channels-first), t: [B, 1], condition_src: [B, S, dim],
    condition_mask: [B, 1, 1, S] additive log-mask (as passed by generate())."""
    B, C, T = z.shape
    D = params['w_in'].shape[1]
    S = condition_src.shape[1]
    hidden = params['ffn_w1'].shape[2]
    L = params['attn_w'].shape[0]
    half = params['freqs'].shape[1]

    # Glue done ONCE in the wrapper (instead of every layer grid step):
    #   * z -> [B, T, C] so the in-kernel in_proj is a plain MXU matmul (removes the
    #     former O(B*T^2*C) identity-matmul transpose in the prologue),
    #   * conditioning flattened to [B*S, D],
    #   * additive log-mask clamped to a finite value (guards -inf rows).
    z_t = jnp.transpose(z, (0, 2, 1))                   # [B, T, C]
    cond_flat = condition_src.reshape(B * S, D)         # [B*S, D]
    mask3d = jnp.maximum(condition_mask.reshape(B, 1, S), -1e9)

    kernel = make_fused_flow_kernel(B=B, T=T, C=C, D=D, S=S, H=num_heads,
                                    hidden=hidden, num_layers=L)

    def full_spec(shape):
        nd = len(shape)
        return pl.BlockSpec(tuple(shape), lambda b, l, nd=nd: (0,) * nd)

    def layer_spec(shape):
        nd = len(shape)
        return pl.BlockSpec((1,) + tuple(shape[1:]),
                            lambda b, l, nd=nd: (l,) + (0,) * (nd - 1))

    out = pl.pallas_call(
        kernel,
        out_shape=jax.ShapeDtypeStruct((B, C, T), jnp.float32),
        grid=(B, L),
        in_specs=[
            pl.BlockSpec((1, T, C), lambda b, l: (b, 0, 0)),        # z (as [B, T, C])
            pl.BlockSpec(memory_space=pltpu.MemorySpace.SMEM),      # t (scalars)
            pl.BlockSpec((S, D), lambda b, l: (b, 0)),              # cond (flattened)
            pl.BlockSpec((1, 1, S), lambda b, l: (b, 0, 0)),        # log-mask (clamped)
            full_spec((1, half)),                                   # freqs
            full_spec(params['te_w1'].shape),
            full_spec(params['te_w2'].shape),
            full_spec(params['w_in'].shape),
            full_spec(params['w_out'].shape),
            layer_spec(params['attn_w'].shape),
            layer_spec(params['attn_b'].shape),
            layer_spec(params['ffn_w1'].shape),
            layer_spec(params['ffn_b1'].shape),
            layer_spec(params['ffn_w2'].shape),
            layer_spec(params['ffn_b2'].shape),
            layer_spec(params['ln'].shape),
        ],
        out_specs=pl.BlockSpec((1, C, T), lambda b, l: (b, 0, 0)),  # written at l == L-1
        scratch_shapes=[pltpu.VMEM((T, D), jnp.float32),            # x resident across layers
                        pltpu.VMEM((T, D), jnp.float32)],           # per-head attn output
        compiler_params=pltpu.CompilerParams(
            # batch axis can be split across TensorCores (v7x); layer axis is sequential
            dimension_semantics=("parallel", "arbitrary"),
            # Explicit VMEM budget (scoped defaults: 16 MiB v5e / 32 MiB v6e,v7x).
            # TODO(synk): re-derive for production D/hidden/T, esp. v7x's 64 MiB VMEM.
            vmem_limit_bytes=48 * 1024 * 1024),
    )(z_t, t, cond_flat, mask3d,
      params['freqs'], params['te_w1'], params['te_w2'],
      params['w_in'], params['w_out'],
      params['attn_w'], params['attn_b'],
      params['ffn_w1'], params['ffn_b1'], params['ffn_w2'], params['ffn_b2'],
      params['ln'])
    return out


# ----------------------------------------------------------------------------- #
# Main
# ----------------------------------------------------------------------------- #
if __name__ == "__main__":
    B, C, T = 2, 16, 8          # batch, latent_dim, sequence length (smoke-test sizes;
    D, H, HIDDEN = 32, 4, 128   # production dims should keep lane axes multiples of 128)
    FREQ = 256                  # frequency_embedding_size (module default)
    S = 8                       # conditioning sequence length
    NUM_LAYERS = 2

    key = jax.random.PRNGKey(0)
    k_z, k_t, k_c, k_p = jax.random.split(key, 4)

    z = jax.random.normal(k_z, (B, C, T), jnp.float32)
    t = jax.random.uniform(k_t, (B, 1), jnp.float32, minval=0.05, maxval=0.95)
    condition_src = jax.random.normal(k_c, (B, S, D), jnp.float32)
    bin_mask = jnp.ones((B, S), jnp.float32).at[1, -1].set(0.0)
    condition_mask = jnp.log(bin_mask)[:, None, None, :]   # [B,1,1,S], as in generate()

    params = init_flow_params(k_p, latent_dim=C, dim=D, hidden=HIDDEN,
                              freq_dim=FREQ, num_layers=NUM_LAYERS)

    out = flow_model_forward(params, z, t, condition_src, condition_mask, num_heads=H)
    out = jax.block_until_ready(out)

    assert out.shape == (B, C, T), out.shape
    assert bool(jnp.all(jnp.isfinite(out)))
    print("KERNEL_OK")
</pallas_src>

<mosaic_0001>
module attributes {stable_mosaic.version = 11 : i64} {
  func.func @kernel(%arg0: i32, %arg1: i32, %arg2: memref<1x8x16xf32, #tpu.memory_space<vmem>>, %arg3: memref<2x1xf32, #tpu.memory_space<smem>>, %arg4: memref<8x32xf32, #tpu.memory_space<vmem>>, %arg5: memref<1x1x8xf32, #tpu.memory_space<vmem>>, %arg6: memref<1x128xf32, #tpu.memory_space<vmem>>, %arg7: memref<256x32xbf16, #tpu.memory_space<vmem>>, %arg8: memref<32x32xbf16, #tpu.memory_space<vmem>>, %arg9: memref<16x32xbf16, #tpu.memory_space<vmem>>, %arg10: memref<16x32xbf16, #tpu.memory_space<vmem>>, %arg11: memref<1x256x32xbf16, #tpu.memory_space<vmem>>, %arg12: memref<1x8x32xf32, #tpu.memory_space<vmem>>, %arg13: memref<1x32x128xbf16, #tpu.memory_space<vmem>>, %arg14: memref<1x1x128xf32, #tpu.memory_space<vmem>>, %arg15: memref<1x128x32xbf16, #tpu.memory_space<vmem>>, %arg16: memref<1x1x32xf32, #tpu.memory_space<vmem>>, %arg17: memref<1x6x32xf32, #tpu.memory_space<vmem>>, %arg18: memref<1x16x8xf32, #tpu.memory_space<vmem>>, %arg19: memref<8x32xf32, #tpu.memory_space<vmem>>, %arg20: memref<8x32xf32, #tpu.memory_space<vmem>>) attributes {dimension_semantics = [#tpu.dimension_semantics<parallel>, #tpu.dimension_semantics<arbitrary>], iteration_bounds = array<i64: 2, 2>, scalar_prefetch = 0 : i64, scratch_operands = 2 : i64, tpu.core_type = #tpu.core_type<tc>, window_params = [{transform_indices = @transform_0, window_bounds = array<i64: 1, 8, 16>}, {transform_indices = @transform_1, window_bounds = array<i64: 2, 1>}, {transform_indices = @transform_2, window_bounds = array<i64: 8, 32>}, {transform_indices = @transform_3, window_bounds = array<i64: 1, 1, 8>}, {pipeline_mode = #tpu.pipeline_mode<synchronous>, transform_indices = @transform_4, window_bounds = array<i64: 1, 128>}, {pipeline_mode = #tpu.pipeline_mode<synchronous>, transform_indices = @transform_5, window_bounds = array<i64: 256, 32>}, {pipeline_mode = #tpu.pipeline_mode<synchronous>, transform_indices = @transform_6, window_bounds = array<i64: 32, 32>}, {pipeline_mode = #tpu.pipeline_mode<synchronous>, transform_indices = @transform_7, window_bounds = array<i64: 16, 32>}, {pipeline_mode = #tpu.pipeline_mode<synchronous>, transform_indices = @transform_8, window_bounds = array<i64: 16, 32>}, {transform_indices = @transform_9, window_bounds = array<i64: 1, 256, 32>}, {transform_indices = @transform_10, window_bounds = array<i64: 1, 8, 32>}, {transform_indices = @transform_11, window_bounds = array<i64: 1, 32, 128>}, {transform_indices = @transform_12, window_bounds = array<i64: 1, 1, 128>}, {transform_indices = @transform_13, window_bounds = array<i64: 1, 128, 32>}, {transform_indices = @transform_14, window_bounds = array<i64: 1, 1, 32>}, {transform_indices = @transform_15, window_bounds = array<i64: 1, 6, 32>}, {transform_indices = @transform_16, window_bounds = array<i64: 1, 16, 8>}]} {
    %c0_i32 = arith.constant 0 : i32
    %0 = arith.cmpi eq, %arg1, %c0_i32 : i32
    %1 = arith.extui %0 : i1 to i32
    %c0_i32_0 = arith.constant 0 : i32
    %2 = arith.cmpi ne, %1, %c0_i32_0 : i32
    scf.if %2 {
      %357 = arith.index_cast %arg0 : i32 to index
      %c0_164 = arith.constant 0 : index
      %358 = memref.load %arg3[%357, %c0_164] : memref<2x1xf32, #tpu.memory_space<smem>>
      %c0_165 = arith.constant 0 : index
      %c0_166 = arith.constant 0 : index
      %359 = vector.load %arg6[%c0_165, %c0_166] : memref<1x128xf32, #tpu.memory_space<vmem>>, vector<1x128xf32>
      %360 = vector.broadcast %358 : f32 to vector<1x128xf32>
      %361 = arith.mulf %360, %359 : vector<1x128xf32>
      %362 = math.cos %361 : vector<1x128xf32>
      %363 = math.sin %361 : vector<1x128xf32>
      %364 = tpu.concatenate %362, %363 in 1 : vector<1x128xf32>, vector<1x128xf32> -> vector<1x256xf32>
      %365 = arith.truncf %364 : vector<1x256xf32> to vector<1x256xbf16>
      %c0_167 = arith.constant 0 : index
      %c0_168 = arith.constant 0 : index
      %366 = vector.load %arg7[%c0_167, %c0_168] : memref<256x32xbf16, #tpu.memory_space<vmem>>, vector<256x32xbf16>
      %cst_169 = arith.constant dense<0.000000e+00> : vector<1x32xf32>
      %367 = tpu.matmul %365, %366, %cst_169 {dimension_numbers = #tpu.dot_dimension_numbers<[1], [0], [0], [1], [0, 0, 1, 1], [], []>} : vector<1x256xbf16>, vector<256x32xbf16>, vector<1x32xf32> -> vector<1x32xf32>
      %368 = arith.negf %367 : vector<1x32xf32>
      %369 = math.exp %368 : vector<1x32xf32>
      %cst_170 = arith.constant 1.000000e+00 : f32
      %370 = vector.broadcast %cst_170 : f32 to vector<1x32xf32>
      %371 = arith.addf %370, %369 : vector<1x32xf32>
      %372 = arith.divf %370, %371 : vector<1x32xf32>
      %373 = arith.mulf %367, %372 : vector<1x32xf32>
      %374 = arith.truncf %373 : vector<1x32xf32> to vector<1x32xbf16>
      %c0_171 = arith.constant 0 : index
      %c0_172 = arith.constant 0 : index
      %375 = vector.load %arg8[%c0_171, %c0_172] : memref<32x32xbf16, #tpu.memory_space<vmem>>, vector<32x32xbf16>
      %cst_173 = arith.constant dense<0.000000e+00> : vector<1x32xf32>
      %376 = tpu.matmul %374, %375, %cst_173 {dimension_numbers = #tpu.dot_dimension_numbers<[1], [0], [0], [1], [0, 0, 1, 1], [], []>} : vector<1x32xbf16>, vector<32x32xbf16>, vector<1x32xf32> -> vector<1x32xf32>
      %377 = arith.mulf %358, %358 : f32
      %cst_174 = arith.constant 1.000000e+00 : f32
      %378 = arith.subf %cst_174, %358 : f32
      %cst_175 = arith.constant 1.000000e+00 : f32
      %379 = arith.subf %cst_175, %358 : f32
      %380 = arith.mulf %378, %379 : f32
      %381 = arith.addf %377, %380 : f32
      %382 = math.rsqrt %381 : f32
      %c0_176 = arith.constant 0 : index
      %c0_177 = arith.constant 0 : index
      %c0_178 = arith.constant 0 : index
      %383 = vector.load %arg2[%c0_176, %c0_177, %c0_178] : memref<1x8x16xf32, #tpu.memory_space<vmem>>, vector<1x8x16xf32>
      %384 = vector.shape_cast %383 : vector<1x8x16xf32> to vector<8x16xf32>
      %385 = vector.broadcast %382 : f32 to vector<8x16xf32>
      %386 = arith.mulf %384, %385 : vector<8x16xf32>
      %387 = arith.truncf %386 : vector<8x16xf32> to vector<8x16xbf16>
      %c0_179 = arith.constant 0 : index
      %c0_180 = arith.constant 0 : index
      %388 = vector.load %arg9[%c0_179, %c0_180] : memref<16x32xbf16, #tpu.memory_space<vmem>>, vector<16x32xbf16>
      %cst_181 = arith.constant dense<0.000000e+00> : vector<8x32xf32>
      %389 = tpu.matmul %387, %388, %cst_181 {dimension_numbers = #tpu.dot_dimension_numbers<[1], [0], [0], [1], [0, 0, 1, 1], [], []>} : vector<8x16xbf16>, vector<16x32xbf16>, vector<8x32xf32> -> vector<8x32xf32>
      %390 = vector.broadcast %376 : vector<1x32xf32> to vector<8x32xf32>
      %391 = arith.addf %389, %390 : vector<8x32xf32>
      %c0_182 = arith.constant 0 : index
      %c0_183 = arith.constant 0 : index
      %392 = vector.load %arg19[%c0_182, %c0_183] : memref<8x32xf32, #tpu.memory_space<vmem>>, vector<8x32xf32>
      tpu.vector_store %arg19[%c0_182, %c0_183], %391 {strides = array<i32>} : memref<8x32xf32, #tpu.memory_space<vmem>>, vector<8x32xf32>,
    } else {
    }
    %c0 = arith.constant 0 : index
    %c0_1 = arith.constant 0 : index
    %3 = vector.load %arg19[%c0, %c0_1] : memref<8x32xf32, #tpu.memory_space<vmem>>, vector<8x32xf32>
    %4 = arith.truncf %3 : vector<8x32xf32> to vector<8x32xbf16>
    %c0_2 = arith.constant 0 : index
    %c0_3 = arith.constant 0 : index
    %5 = vector.load %arg4[%c0_2, %c0_3] : memref<8x32xf32, #tpu.memory_space<vmem>>, vector<8x32xf32>
    %6 = arith.truncf %5 : vector<8x32xf32> to vector<8x32xbf16>
    %c0_4 = arith.constant 0 : index
    %c0_5 = arith.constant 0 : index
    %c0_6 = arith.constant 0 : index
    %7 = vector.load %arg5[%c0_4, %c0_5, %c0_6] : memref<1x1x8xf32, #tpu.memory_space<vmem>>, vector<1x1x8xf32>
    %8 = vector.shape_cast %7 : vector<1x1x8xf32> to vector<1x8xf32>
    %c0_7 = arith.constant 0 : index
    %c0_8 = arith.constant 0 : index
    %c0_9 = arith.constant 0 : index
    %9 = vector.load %arg11[%c0_7, %c0_8, %c0_9] : memref<1x256x32xbf16, #tpu.memory_space<vmem>>, vector<1x32x32xbf16>
    %10 = vector.shape_cast %9 : vector<1x32x32xbf16> to vector<32x32xbf16>
    %cst = arith.constant dense<0.000000e+00> : vector<8x32xf32>
    %11 = tpu.matmul %4, %10, %cst {dimension_numbers = #tpu.dot_dimension_numbers<[1], [0], [0], [1], [0, 0, 1, 1], [], []>} : vector<8x32xbf16>, vector<32x32xbf16>, vector<8x32xf32> -> vector<8x32xf32>
    %c0_10 = arith.constant 0 : index
    %c0_11 = arith.constant 0 : index
    %c0_12 = arith.constant 0 : index
    %12 = vector.load %arg12[%c0_10, %c0_11, %c0_12] : memref<1x8x32xf32, #tpu.memory_space<vmem>>, vector<1x1x32xf32>
    %13 = vector.shape_cast %12 : vector<1x1x32xf32> to vector<1x32xf32>
    %14 = vector.broadcast %13 : vector<1x32xf32> to vector<8x32xf32>
    %15 = arith.addf %11, %14 : vector<8x32xf32>
    %cst_13 = arith.constant 0.353553385 : f32
    %16 = vector.broadcast %cst_13 : f32 to vector<8x32xf32>
    %17 = arith.mulf %15, %16 : vector<8x32xf32>
    %c0_14 = arith.constant 0 : index
    %c32 = arith.constant 32 : index
    %c0_15 = arith.constant 0 : index
    %18 = vector.load %arg11[%c0_14, %c32, %c0_15] : memref<1x256x32xbf16, #tpu.memory_space<vmem>>, vector<1x32x32xbf16>
    %19 = vector.shape_cast %18 : vector<1x32x32xbf16> to vector<32x32xbf16>
    %cst_16 = arith.constant dense<0.000000e+00> : vector<8x32xf32>
    %20 = tpu.matmul %4, %19, %cst_16 {dimension_numbers = #tpu.dot_dimension_numbers<[1], [0], [0], [1], [0, 0, 1, 1], [], []>} : vector<8x32xbf16>, vector<32x32xbf16>, vector<8x32xf32> -> vector<8x32xf32>
    %c0_17 = arith.constant 0 : index
    %c1 = arith.constant 1 : index
    %c0_18 = arith.constant 0 : index
    %21 = vector.load %arg12[%c0_17, %c1, %c0_18] : memref<1x8x32xf32, #tpu.memory_space<vmem>>, vector<1x1x32xf32>
    %22 = vector.shape_cast %21 : vector<1x1x32xf32> to vector<1x32xf32>
    %23 = vector.broadcast %22 : vector<1x32xf32> to vector<8x32xf32>
    %24 = arith.addf %20, %23 : vector<8x32xf32>
    %c0_19 = arith.constant 0 : index
    %c64 = arith.constant 64 : index
    %c0_20 = arith.constant 0 : index
    %25 = vector.load %arg11[%c0_19, %c64, %c0_20] : memref<1x256x32xbf16, #tpu.memory_space<vmem>>, vector<1x32x32xbf16>
    %26 = vector.shape_cast %25 : vector<1x32x32xbf16> to vector<32x32xbf16>
    %cst_21 = arith.constant dense<0.000000e+00> : vector<8x32xf32>
    %27 = tpu.matmul %4, %26, %cst_21 {dimension_numbers = #tpu.dot_dimension_numbers<[1], [0], [0], [1], [0, 0, 1, 1], [], []>} : vector<8x32xbf16>, vector<32x32xbf16>, vector<8x32xf32> -> vector<8x32xf32>
    %c0_22 = arith.constant 0 : index
    %c2 = arith.constant 2 : index
    %c0_23 = arith.constant 0 : index
    %28 = vector.load %arg12[%c0_22, %c2, %c0_23] : memref<1x8x32xf32, #tpu.memory_space<vmem>>, vector<1x1x32xf32>
    %29 = vector.shape_cast %28 : vector<1x1x32xf32> to vector<1x32xf32>
    %30 = vector.broadcast %29 : vector<1x32xf32> to vector<8x32xf32>
    %31 = arith.addf %27, %30 : vector<8x32xf32>
    %32 = arith.truncf %17 : vector<8x32xf32> to vector<8x32xbf16>
    %33 = arith.truncf %24 : vector<8x32xf32> to vector<8x32xbf16>
    %34 = arith.truncf %31 : vector<8x32xf32> to vector<8x32xbf16>
    %35 = vector.extract_strided_slice %32 {offsets = [0, 0], sizes = [8, 8], strides = [1, 1]} : vector<8x32xbf16> to vector<8x8xbf16>
    %36 = vector.extract_strided_slice %33 {offsets = [0, 0], sizes = [8, 8], strides = [1, 1]} : vector<8x32xbf16> to vector<8x8xbf16>
    %cst_24 = arith.constant dense<0.000000e+00> : vector<8x8xf32>
    %37 = tpu.matmul %35, %36, %cst_24 {dimension_numbers = #tpu.dot_dimension_numbers<[1], [1], [0], [0], [0, 0, 1, 0], [], []>} : vector<8x8xbf16>, vector<8x8xbf16>, vector<8x8xf32> -> vector<8x8xf32>
    %cst_25 = arith.constant dense<0xFF800000> : vector<8xf32>
    %38 = vector.multi_reduction <maximumf>, %37, %cst_25 [1] : vector<8x8xf32> to vector<8xf32>
    %39 = vector.shape_cast %38 : vector<8xf32> to vector<8x1xf32>
    %40 = vector.broadcast %39 : vector<8x1xf32> to vector<8x8xf32>
    %41 = arith.subf %37, %40 : vector<8x8xf32>
    %42 = math.exp %41 : vector<8x8xf32>
    %cst_26 = arith.constant dense<0.000000e+00> : vector<8xf32>
    %43 = vector.multi_reduction <add>, %42, %cst_26 [1] : vector<8x8xf32> to vector<8xf32>
    %44 = vector.shape_cast %43 : vector<8xf32> to vector<8x1xf32>
    %45 = tpu.reciprocal %44 {approx = true} : vector<8x1xf32> -> vector<8x1xf32>
    %46 = vector.broadcast %45 : vector<8x1xf32> to vector<8x8xf32>
    %47 = arith.mulf %42, %46 : vector<8x8xf32>
    %48 = arith.truncf %47 : vector<8x8xf32> to vector<8x8xbf16>
    %49 = vector.extract_strided_slice %34 {offsets = [0, 0], sizes = [8, 8], strides = [1, 1]} : vector<8x32xbf16> to vector<8x8xbf16>
    %cst_27 = arith.constant dense<0.000000e+00> : vector<8x8xf32>
    %50 = tpu.matmul %48, %49, %cst_27 {dimension_numbers = #tpu.dot_dimension_numbers<[1], [0], [0], [1], [0, 0, 1, 1], [], []>} : vector<8x8xbf16>, vector<8x8xbf16>, vector<8x8xf32> -> vector<8x8xf32>
    %c0_28 = arith.constant 0 : index
    %c0_29 = arith.constant 0 : index
    %51 = vector.load %arg20[%c0_28, %c0_29] : memref<8x32xf32, #tpu.memory_space<vmem>>, vector<8x8xf32>
    tpu.vector_store %arg20[%c0_28, %c0_29], %50 {strides = array<i32>} : memref<8x32xf32, #tpu.memory_space<vmem>>, vector<8x8xf32>,
    %52 = vector.extract_strided_slice %32 {offsets = [0, 8], sizes = [8, 8], strides = [1, 1]} : vector<8x32xbf16> to vector<8x8xbf16>
    %53 = vector.extract_strided_slice %33 {offsets = [0, 8], sizes = [8, 8], strides = [1, 1]} : vector<8x32xbf16> to vector<8x8xbf16>
    %cst_30 = arith.constant dense<0.000000e+00> : vector<8x8xf32>
    %54 = tpu.matmul %52, %53, %cst_30 {dimension_numbers = #tpu.dot_dimension_numbers<[1], [1], [0], [0], [0, 0, 1, 0], [], []>} : vector<8x8xbf16>, vector<8x8xbf16>, vector<8x8xf32> -> vector<8x8xf32>
    %cst_31 = arith.constant dense<0xFF800000> : vector<8xf32>
    %55 = vector.multi_reduction <maximumf>, %54, %cst_31 [1] : vector<8x8xf32> to vector<8xf32>
    %56 = vector.shape_cast %55 : vector<8xf32> to vector<8x1xf32>
    %57 = vector.broadcast %56 : vector<8x1xf32> to vector<8x8xf32>
    %58 = arith.subf %54, %57 : vector<8x8xf32>
    %59 = math.exp %58 : vector<8x8xf32>
    %cst_32 = arith.constant dense<0.000000e+00> : vector<8xf32>
    %60 = vector.multi_reduction <add>, %59, %cst_32 [1] : vector<8x8xf32> to vector<8xf32>
    %61 = vector.shape_cast %60 : vector<8xf32> to vector<8x1xf32>
    %62 = tpu.reciprocal %61 {approx = true} : vector<8x1xf32> -> vector<8x1xf32>
    %63 = vector.broadcast %62 : vector<8x1xf32> to vector<8x8xf32>
    %64 = arith.mulf %59, %63 : vector<8x8xf32>
    %65 = arith.truncf %64 : vector<8x8xf32> to vector<8x8xbf16>
    %66 = vector.extract_strided_slice %34 {offsets = [0, 8], sizes = [8, 8], strides = [1, 1]} : vector<8x32xbf16> to vector<8x8xbf16>
    %cst_33 = arith.constant dense<0.000000e+00> : vector<8x8xf32>
    %67 = tpu.matmul %65, %66, %cst_33 {dimension_numbers = #tpu.dot_dimension_numbers<[1], [0], [0], [1], [0, 0, 1, 1], [], []>} : vector<8x8xbf16>, vector<8x8xbf16>, vector<8x8xf32> -> vector<8x8xf32>
    %c0_34 = arith.constant 0 : index
    %c8 = arith.constant 8 : index
    %68 = vector.load %arg20[%c0_34, %c8] : memref<8x32xf32, #tpu.memory_space<vmem>>, vector<8x8xf32>
    tpu.vector_store %arg20[%c0_34, %c8], %67 {strides = array<i32>} : memref<8x32xf32, #tpu.memory_space<vmem>>, vector<8x8xf32>,
    %69 = vector.extract_strided_slice %32 {offsets = [0, 16], sizes = [8, 8], strides = [1, 1]} : vector<8x32xbf16> to vector<8x8xbf16>
    %70 = vector.extract_strided_slice %33 {offsets = [0, 16], sizes = [8, 8], strides = [1, 1]} : vector<8x32xbf16> to vector<8x8xbf16>
    %cst_35 = arith.constant dense<0.000000e+00> : vector<8x8xf32>
    %71 = tpu.matmul %69, %70, %cst_35 {dimension_numbers = #tpu.dot_dimension_numbers<[1], [1], [0], [0], [0, 0, 1, 0], [], []>} : vector<8x8xbf16>, vector<8x8xbf16>, vector<8x8xf32> -> vector<8x8xf32>
    %cst_36 = arith.constant dense<0xFF800000> : vector<8xf32>
    %72 = vector.multi_reduction <maximumf>, %71, %cst_36 [1] : vector<8x8xf32> to vector<8xf32>
    %73 = vector.shape_cast %72 : vector<8xf32> to vector<8x1xf32>
    %74 = vector.broadcast %73 : vector<8x1xf32> to vector<8x8xf32>
    %75 = arith.subf %71, %74 : vector<8x8xf32>
    %76 = math.exp %75 : vector<8x8xf32>
    %cst_37 = arith.constant dense<0.000000e+00> : vector<8xf32>
    %77 = vector.multi_reduction <add>, %76, %cst_37 [1] : vector<8x8xf32> to vector<8xf32>
    %78 = vector.shape_cast %77 : vector<8xf32> to vector<8x1xf32>
    %79 = tpu.reciprocal %78 {approx = true} : vector<8x1xf32> -> vector<8x1xf32>
    %80 = vector.broadcast %79 : vector<8x1xf32> to vector<8x8xf32>
    %81 = arith.mulf %76, %80 : vector<8x8xf32>
    %82 = arith.truncf %81 : vector<8x8xf32> to vector<8x8xbf16>
    %83 = vector.extract_strided_slice %34 {offsets = [0, 16], sizes = [8, 8], strides = [1, 1]} : vector<8x32xbf16> to vector<8x8xbf16>
    %cst_38 = arith.constant dense<0.000000e+00> : vector<8x8xf32>
    %84 = tpu.matmul %82, %83, %cst_38 {dimension_numbers = #tpu.dot_dimension_numbers<[1], [0], [0], [1], [0, 0, 1, 1], [], []>} : vector<8x8xbf16>, vector<8x8xbf16>, vector<8x8xf32> -> vector<8x8xf32>
    %c0_39 = arith.constant 0 : index
    %c16 = arith.constant 16 : index
    %85 = vector.load %arg20[%c0_39, %c16] : memref<8x32xf32, #tpu.memory_space<vmem>>, vector<8x8xf32>
    tpu.vector_store %arg20[%c0_39, %c16], %84 {strides = array<i32>} : memref<8x32xf32, #tpu.memory_space<vmem>>, vector<8x8xf32>,
    %86 = vector.extract_strided_slice %32 {offsets = [0, 24], sizes = [8, 8], strides = [1, 1]} : vector<8x32xbf16> to vector<8x8xbf16>
    %87 = vector.extract_strided_slice %33 {offsets = [0, 24], sizes = [8, 8], strides = [1, 1]} : vector<8x32xbf16> to vector<8x8xbf16>
    %cst_40 = arith.constant dense<0.000000e+00> : vector<8x8xf32>
    %88 = tpu.matmul %86, %87, %cst_40 {dimension_numbers = #tpu.dot_dimension_numbers<[1], [1], [0], [0], [0, 0, 1, 0], [], []>} : vector<8x8xbf16>, vector<8x8xbf16>, vector<8x8xf32> -> vector<8x8xf32>
    %cst_41 = arith.constant dense<0xFF800000> : vector<8xf32>
    %89 = vector.multi_reduction <maximumf>, %88, %cst_41 [1] : vector<8x8xf32> to vector<8xf32>
    %90 = vector.shape_cast %89 : vector<8xf32> to vector<8x1xf32>
    %91 = vector.broadcast %90 : vector<8x1xf32> to vector<8x8xf32>
    %92 = arith.subf %88, %91 : vector<8x8xf32>
    %93 = math.exp %92 : vector<8x8xf32>
    %cst_42 = arith.constant dense<0.000000e+00> : vector<8xf32>
    %94 = vector.multi_reduction <add>, %93, %cst_42 [1] : vector<8x8xf32> to vector<8xf32>
    %95 = vector.shape_cast %94 : vector<8xf32> to vector<8x1xf32>
    %96 = tpu.reciprocal %95 {approx = true} : vector<8x1xf32> -> vector<8x1xf32>
    %97 = vector.broadcast %96 : vector<8x1xf32> to vector<8x8xf32>
    %98 = arith.mulf %93, %97 : vector<8x8xf32>
    %99 = arith.truncf %98 : vector<8x8xf32> to vector<8x8xbf16>
    %100 = vector.extract_strided_slice %34 {offsets = [0, 24], sizes = [8, 8], strides = [1, 1]} : vector<8x32xbf16> to vector<8x8xbf16>
    %cst_43 = arith.constant dense<0.000000e+00> : vector<8x8xf32>
    %101 = tpu.matmul %99, %100, %cst_43 {dimension_numbers = #tpu.dot_dimension_numbers<[1], [0], [0], [1], [0, 0, 1, 1], [], []>} : vector<8x8xbf16>, vector<8x8xbf16>, vector<8x8xf32> -> vector<8x8xf32>
    %c0_44 = arith.constant 0 : index
    %c24 = arith.constant 24 : index
    %102 = vector.load %arg20[%c0_44, %c24] : memref<8x32xf32, #tpu.memory_space<vmem>>, vector<8x8xf32>
    tpu.vector_store %arg20[%c0_44, %c24], %101 {strides = array<i32>} : memref<8x32xf32, #tpu.memory_space<vmem>>, vector<8x8xf32>,
    %c0_45 = arith.constant 0 : index
    %c0_46 = arith.constant 0 : index
    %103 = vector.load %arg20[%c0_45, %c0_46] : memref<8x32xf32, #tpu.memory_space<vmem>>, vector<8x32xf32>
    %104 = arith.truncf %103 : vector<8x32xf32> to vector<8x32xbf16>
    %c0_47 = arith.constant 0 : index
    %c96 = arith.constant 96 : index
    %c0_48 = arith.constant 0 : index
    %105 = vector.load %arg11[%c0_47, %c96, %c0_48] : memref<1x256x32xbf16, #tpu.memory_space<vmem>>, vector<1x32x32xbf16>
    %106 = vector.shape_cast %105 : vector<1x32x32xbf16> to vector<32x32xbf16>
    %cst_49 = arith.constant dense<0.000000e+00> : vector<8x32xf32>
    %107 = tpu.matmul %104, %106, %cst_49 {dimension_numbers = #tpu.dot_dimension_numbers<[1], [0], [0], [1], [0, 0, 1, 1], [], []>} : vector<8x32xbf16>, vector<32x32xbf16>, vector<8x32xf32> -> vector<8x32xf32>
    %c0_50 = arith.constant 0 : index
    %c3 = arith.constant 3 : index
    %c0_51 = arith.constant 0 : index
    %108 = vector.load %arg12[%c0_50, %c3, %c0_51] : memref<1x8x32xf32, #tpu.memory_space<vmem>>, vector<1x1x32xf32>
    %109 = vector.shape_cast %108 : vector<1x1x32xf32> to vector<1x32xf32>
    %110 = vector.broadcast %109 : vector<1x32xf32> to vector<8x32xf32>
    %111 = arith.addf %107, %110 : vector<8x32xf32>
    %112 = arith.addf %3, %111 : vector<8x32xf32>
    %c0_52 = arith.constant 0 : index
    %c0_53 = arith.constant 0 : index
    %c0_54 = arith.constant 0 : index
    %113 = vector.load %arg17[%c0_52, %c0_53, %c0_54] : memref<1x6x32xf32, #tpu.memory_space<vmem>>, vector<1x1x32xf32>
    %114 = vector.shape_cast %113 : vector<1x1x32xf32> to vector<1x32xf32>
    %c0_55 = arith.constant 0 : index
    %c1_56 = arith.constant 1 : index
    %c0_57 = arith.constant 0 : index
    %115 = vector.load %arg17[%c0_55, %c1_56, %c0_57] : memref<1x6x32xf32, #tpu.memory_space<vmem>>, vector<1x1x32xf32>
    %116 = vector.shape_cast %115 : vector<1x1x32xf32> to vector<1x32xf32>
    %cst_58 = arith.constant dense<0.000000e+00> : vector<8xf32>
    %117 = vector.multi_reduction <add>, %112, %cst_58 [1] : vector<8x32xf32> to vector<8xf32>
    %118 = vector.shape_cast %117 : vector<8xf32> to vector<8x1xf32>
    %cst_59 = arith.constant 3.125000e-02 : f32
    %119 = vector.broadcast %cst_59 : f32 to vector<8x1xf32>
    %120 = arith.mulf %118, %119 : vector<8x1xf32>
    %121 = vector.broadcast %120 : vector<8x1xf32> to vector<8x32xf32>
    %122 = arith.subf %112, %121 : vector<8x32xf32>
    %123 = arith.mulf %122, %122 : vector<8x32xf32>
    %cst_60 = arith.constant dense<0.000000e+00> : vector<8xf32>
    %124 = vector.multi_reduction <add>, %123, %cst_60 [1] : vector<8x32xf32> to vector<8xf32>
    %125 = vector.shape_cast %124 : vector<8xf32> to vector<8x1xf32>
    %cst_61 = arith.constant 3.125000e-02 : f32
    %126 = vector.broadcast %cst_61 : f32 to vector<8x1xf32>
    %127 = arith.mulf %125, %126 : vector<8x1xf32>
    %cst_62 = arith.constant 9.99999974E-6 : f32
    %128 = vector.broadcast %cst_62 : f32 to vector<8x1xf32>
    %129 = arith.addf %127, %128 : vector<8x1xf32>
    %130 = math.rsqrt %129 : vector<8x1xf32>
    %131 = vector.broadcast %130 : vector<8x1xf32> to vector<8x32xf32>
    %132 = arith.mulf %122, %131 : vector<8x32xf32>
    %133 = vector.broadcast %114 : vector<1x32xf32> to vector<8x32xf32>
    %134 = arith.mulf %132, %133 : vector<8x32xf32>
    %135 = vector.broadcast %116 : vector<1x32xf32> to vector<8x32xf32>
    %136 = arith.addf %134, %135 : vector<8x32xf32>
    %137 = arith.truncf %136 : vector<8x32xf32> to vector<8x32xbf16>
    %c0_63 = arith.constant 0 : index
    %c128 = arith.constant 128 : index
    %c0_64 = arith.constant 0 : index
    %138 = vector.load %arg11[%c0_63, %c128, %c0_64] : memref<1x256x32xbf16, #tpu.memory_space<vmem>>, vector<1x32x32xbf16>
    %139 = vector.shape_cast %138 : vector<1x32x32xbf16> to vector<32x32xbf16>
    %cst_65 = arith.constant dense<0.000000e+00> : vector<8x32xf32>
    %140 = tpu.matmul %137, %139, %cst_65 {dimension_numbers = #tpu.dot_dimension_numbers<[1], [0], [0], [1], [0, 0, 1, 1], [], []>} : vector<8x32xbf16>, vector<32x32xbf16>, vector<8x32xf32> -> vector<8x32xf32>
    %c0_66 = arith.constant 0 : index
    %c4 = arith.constant 4 : index
    %c0_67 = arith.constant 0 : index
    %141 = vector.load %arg12[%c0_66, %c4, %c0_67] : memref<1x8x32xf32, #tpu.memory_space<vmem>>, vector<1x1x32xf32>
    %142 = vector.shape_cast %141 : vector<1x1x32xf32> to vector<1x32xf32>
    %143 = vector.broadcast %142 : vector<1x32xf32> to vector<8x32xf32>
    %144 = arith.addf %140, %143 : vector<8x32xf32>
    %cst_68 = arith.constant 0.353553385 : f32
    %145 = vector.broadcast %cst_68 : f32 to vector<8x32xf32>
    %146 = arith.mulf %144, %145 : vector<8x32xf32>
    %c0_69 = arith.constant 0 : index
    %c160 = arith.constant 160 : index
    %c0_70 = arith.constant 0 : index
    %147 = vector.load %arg11[%c0_69, %c160, %c0_70] : memref<1x256x32xbf16, #tpu.memory_space<vmem>>, vector<1x32x32xbf16>
    %148 = vector.shape_cast %147 : vector<1x32x32xbf16> to vector<32x32xbf16>
    %cst_71 = arith.constant dense<0.000000e+00> : vector<8x32xf32>
    %149 = tpu.matmul %6, %148, %cst_71 {dimension_numbers = #tpu.dot_dimension_numbers<[1], [0], [0], [1], [0, 0, 1, 1], [], []>} : vector<8x32xbf16>, vector<32x32xbf16>, vector<8x32xf32> -> vector<8x32xf32>
    %c0_72 = arith.constant 0 : index
    %c5 = arith.constant 5 : index
    %c0_73 = arith.constant 0 : index
    %150 = vector.load %arg12[%c0_72, %c5, %c0_73] : memref<1x8x32xf32, #tpu.memory_space<vmem>>, vector<1x1x32xf32>
    %151 = vector.shape_cast %150 : vector<1x1x32xf32> to vector<1x32xf32>
    %152 = vector.broadcast %151 : vector<1x32xf32> to vector<8x32xf32>
    %153 = arith.addf %149, %152 : vector<8x32xf32>
    %c0_74 = arith.constant 0 : index
    %c192 = arith.constant 192 : index
    %c0_75 = arith.constant 0 : index
    %154 = vector.load %arg11[%c0_74, %c192, %c0_75] : memref<1x256x32xbf16, #tpu.memory_space<vmem>>, vector<1x32x32xbf16>
    %155 = vector.shape_cast %154 : vector<1x32x32xbf16> to vector<32x32xbf16>
    %cst_76 = arith.constant dense<0.000000e+00> : vector<8x32xf32>
    %156 = tpu.matmul %6, %155, %cst_76 {dimension_numbers = #tpu.dot_dimension_numbers<[1], [0], [0], [1], [0, 0, 1, 1], [], []>} : vector<8x32xbf16>, vector<32x32xbf16>, vector<8x32xf32> -> vector<8x32xf32>
    %c0_77 = arith.constant 0 : index
    %c6 = arith.constant 6 : index
    %c0_78 = arith.constant 0 : index
    %157 = vector.load %arg12[%c0_77, %c6, %c0_78] : memref<1x8x32xf32, #tpu.memory_space<vmem>>, vector<1x1x32xf32>
    %158 = vector.shape_cast %157 : vector<1x1x32xf32> to vector<1x32xf32>
    %159 = vector.broadcast %158 : vector<1x32xf32> to vector<8x32xf32>
    %160 = arith.addf %156, %159 : vector<8x32xf32>
    %161 = arith.truncf %146 : vector<8x32xf32> to vector<8x32xbf16>
    %162 = arith.truncf %153 : vector<8x32xf32> to vector<8x32xbf16>
    %163 = arith.truncf %160 : vector<8x32xf32> to vector<8x32xbf16>
    %164 = vector.shape_cast %8 : vector<1x8xf32> to vector<1x8xf32>
    %165 = vector.broadcast %164 : vector<1x8xf32> to vector<8x8xf32>
    %166 = vector.extract_strided_slice %161 {offsets = [0, 0], sizes = [8, 8], strides = [1, 1]} : vector<8x32xbf16> to vector<8x8xbf16>
    %167 = vector.extract_strided_slice %162 {offsets = [0, 0], sizes = [8, 8], strides = [1, 1]} : vector<8x32xbf16> to vector<8x8xbf16>
    %cst_79 = arith.constant dense<0.000000e+00> : vector<8x8xf32>
    %168 = tpu.matmul %166, %167, %cst_79 {dimension_numbers = #tpu.dot_dimension_numbers<[1], [1], [0], [0], [0, 0, 1, 0], [], []>} : vector<8x8xbf16>, vector<8x8xbf16>, vector<8x8xf32> -> vector<8x8xf32>
    %169 = arith.addf %168, %165 : vector<8x8xf32>
    %cst_80 = arith.constant dense<0xFF800000> : vector<8xf32>
    %170 = vector.multi_reduction <maximumf>, %169, %cst_80 [1] : vector<8x8xf32> to vector<8xf32>
    %171 = vector.shape_cast %170 : vector<8xf32> to vector<8x1xf32>
    %172 = vector.broadcast %171 : vector<8x1xf32> to vector<8x8xf32>
    %173 = arith.subf %169, %172 : vector<8x8xf32>
    %174 = math.exp %173 : vector<8x8xf32>
    %cst_81 = arith.constant dense<0.000000e+00> : vector<8xf32>
    %175 = vector.multi_reduction <add>, %174, %cst_81 [1] : vector<8x8xf32> to vector<8xf32>
    %176 = vector.shape_cast %175 : vector<8xf32> to vector<8x1xf32>
    %177 = tpu.reciprocal %176 {approx = true} : vector<8x1xf32> -> vector<8x1xf32>
    %178 = vector.broadcast %177 : vector<8x1xf32> to vector<8x8xf32>
    %179 = arith.mulf %174, %178 : vector<8x8xf32>
    %180 = arith.truncf %179 : vector<8x8xf32> to vector<8x8xbf16>
    %181 = vector.extract_strided_slice %163 {offsets = [0, 0], sizes = [8, 8], strides = [1, 1]} : vector<8x32xbf16> to vector<8x8xbf16>
    %cst_82 = arith.constant dense<0.000000e+00> : vector<8x8xf32>
    %182 = tpu.matmul %180, %181, %cst_82 {dimension_numbers = #tpu.dot_dimension_numbers<[1], [0], [0], [1], [0, 0, 1, 1], [], []>} : vector<8x8xbf16>, vector<8x8xbf16>, vector<8x8xf32> -> vector<8x8xf32>
    %c0_83 = arith.constant 0 : index
    %c0_84 = arith.constant 0 : index
    %183 = vector.load %arg20[%c0_83, %c0_84] : memref<8x32xf32, #tpu.memory_space<vmem>>, vector<8x8xf32>
    tpu.vector_store %arg20[%c0_83, %c0_84], %182 {strides = array<i32>} : memref<8x32xf32, #tpu.memory_space<vmem>>, vector<8x8xf32>,
    %184 = vector.extract_strided_slice %161 {offsets = [0, 8], sizes = [8, 8], strides = [1, 1]} : vector<8x32xbf16> to vector<8x8xbf16>
    %185 = vector.extract_strided_slice %162 {offsets = [0, 8], sizes = [8, 8], strides = [1, 1]} : vector<8x32xbf16> to vector<8x8xbf16>
    %cst_85 = arith.constant dense<0.000000e+00> : vector<8x8xf32>
    %186 = tpu.matmul %184, %185, %cst_85 {dimension_numbers = #tpu.dot_dimension_numbers<[1], [1], [0], [0], [0, 0, 1, 0], [], []>} : vector<8x8xbf16>, vector<8x8xbf16>, vector<8x8xf32> -> vector<8x8xf32>
    %187 = arith.addf %186, %165 : vector<8x8xf32>
    %cst_86 = arith.constant dense<0xFF800000> : vector<8xf32>
    %188 = vector.multi_reduction <maximumf>, %187, %cst_86 [1] : vector<8x8xf32> to vector<8xf32>
    %189 = vector.shape_cast %188 : vector<8xf32> to vector<8x1xf32>
    %190 = vector.broadcast %189 : vector<8x1xf32> to vector<8x8xf32>
    %191 = arith.subf %187, %190 : vector<8x8xf32>
    %192 = math.exp %191 : vector<8x8xf32>
    %cst_87 = arith.constant dense<0.000000e+00> : vector<8xf32>
    %193 = vector.multi_reduction <add>, %192, %cst_87 [1] : vector<8x8xf32> to vector<8xf32>
    %194 = vector.shape_cast %193 : vector<8xf32> to vector<8x1xf32>
    %195 = tpu.reciprocal %194 {approx = true} : vector<8x1xf32> -> vector<8x1xf32>
    %196 = vector.broadcast %195 : vector<8x1xf32> to vector<8x8xf32>
    %197 = arith.mulf %192, %196 : vector<8x8xf32>
    %198 = arith.truncf %197 : vector<8x8xf32> to vector<8x8xbf16>
    %199 = vector.extract_strided_slice %163 {offsets = [0, 8], sizes = [8, 8], strides = [1, 1]} : vector<8x32xbf16> to vector<8x8xbf16>
    %cst_88 = arith.constant dense<0.000000e+00> : vector<8x8xf32>
    %200 = tpu.matmul %198, %199, %cst_88 {dimension_numbers = #tpu.dot_dimension_numbers<[1], [0], [0], [1], [0, 0, 1, 1], [], []>} : vector<8x8xbf16>, vector<8x8xbf16>, vector<8x8xf32> -> vector<8x8xf32>
    %c0_89 = arith.constant 0 : index
    %c8_90 = arith.constant 8 : index
    %201 = vector.load %arg20[%c0_89, %c8_90] : memref<8x32xf32, #tpu.memory_space<vmem>>, vector<8x8xf32>
    tpu.vector_store %arg20[%c0_89, %c8_90], %200 {strides = array<i32>} : memref<8x32xf32, #tpu.memory_space<vmem>>, vector<8x8xf32>,
    %202 = vector.extract_strided_slice %161 {offsets = [0, 16], sizes = [8, 8], strides = [1, 1]} : vector<8x32xbf16> to vector<8x8xbf16>
    %203 = vector.extract_strided_slice %162 {offsets = [0, 16], sizes = [8, 8], strides = [1, 1]} : vector<8x32xbf16> to vector<8x8xbf16>
    %cst_91 = arith.constant dense<0.000000e+00> : vector<8x8xf32>
    %204 = tpu.matmul %202, %203, %cst_91 {dimension_numbers = #tpu.dot_dimension_numbers<[1], [1], [0], [0], [0, 0, 1, 0], [], []>} : vector<8x8xbf16>, vector<8x8xbf16>, vector<8x8xf32> -> vector<8x8xf32>
    %205 = arith.addf %204, %165 : vector<8x8xf32>
    %cst_92 = arith.constant dense<0xFF800000> : vector<8xf32>
    %206 = vector.multi_reduction <maximumf>, %205, %cst_92 [1] : vector<8x8xf32> to vector<8xf32>
    %207 = vector.shape_cast %206 : vector<8xf32> to vector<8x1xf32>
    %208 = vector.broadcast %207 : vector<8x1xf32> to vector<8x8xf32>
    %209 = arith.subf %205, %208 : vector<8x8xf32>
    %210 = math.exp %209 : vector<8x8xf32>
    %cst_93 = arith.constant dense<0.000000e+00> : vector<8xf32>
    %211 = vector.multi_reduction <add>, %210, %cst_93 [1] : vector<8x8xf32> to vector<8xf32>
    %212 = vector.shape_cast %211 : vector<8xf32> to vector<8x1xf32>
    %213 = tpu.reciprocal %212 {approx = true} : vector<8x1xf32> -> vector<8x1xf32>
    %214 = vector.broadcast %213 : vector<8x1xf32> to vector<8x8xf32>
    %215 = arith.mulf %210, %214 : vector<8x8xf32>
    %216 = arith.truncf %215 : vector<8x8xf32> to vector<8x8xbf16>
    %217 = vector.extract_strided_slice %163 {offsets = [0, 16], sizes = [8, 8], strides = [1, 1]} : vector<8x32xbf16> to vector<8x8xbf16>
    %cst_94 = arith.constant dense<0.000000e+00> : vector<8x8xf32>
    %218 = tpu.matmul %216, %217, %cst_94 {dimension_numbers = #tpu.dot_dimension_numbers<[1], [0], [0], [1], [0, 0, 1, 1], [], []>} : vector<8x8xbf16>, vector<8x8xbf16>, vector<8x8xf32> -> vector<8x8xf32>
    %c0_95 = arith.constant 0 : index
    %c16_96 = arith.constant 16 : index
    %219 = vector.load %arg20[%c0_95, %c16_96] : memref<8x32xf32, #tpu.memory_space<vmem>>, vector<8x8xf32>
    tpu.vector_store %arg20[%c0_95, %c16_96], %218 {strides = array<i32>} : memref<8x32xf32, #tpu.memory_space<vmem>>, vector<8x8xf32>,
    %220 = vector.extract_strided_slice %161 {offsets = [0, 24], sizes = [8, 8], strides = [1, 1]} : vector<8x32xbf16> to vector<8x8xbf16>
    %221 = vector.extract_strided_slice %162 {offsets = [0, 24], sizes = [8, 8], strides = [1, 1]} : vector<8x32xbf16> to vector<8x8xbf16>
    %cst_97 = arith.constant dense<0.000000e+00> : vector<8x8xf32>
    %222 = tpu.matmul %220, %221, %cst_97 {dimension_numbers = #tpu.dot_dimension_numbers<[1], [1], [0], [0], [0, 0, 1, 0], [], []>} : vector<8x8xbf16>, vector<8x8xbf16>, vector<8x8xf32> -> vector<8x8xf32>
    %223 = arith.addf %222, %165 : vector<8x8xf32>
    %cst_98 = arith.constant dense<0xFF800000> : vector<8xf32>
    %224 = vector.multi_reduction <maximumf>, %223, %cst_98 [1] : vector<8x8xf32> to vector<8xf32>
    %225 = vector.shape_cast %224 : vector<8xf32> to vector<8x1xf32>
    %226 = vector.broadcast %225 : vector<8x1xf32> to vector<8x8xf32>
    %227 = arith.subf %223, %226 : vector<8x8xf32>
    %228 = math.exp %227 : vector<8x8xf32>
    %cst_99 = arith.constant dense<0.000000e+00> : vector<8xf32>
    %229 = vector.multi_reduction <add>, %228, %cst_99 [1] : vector<8x8xf32> to vector<8xf32>
    %230 = vector.shape_cast %229 : vector<8xf32> to vector<8x1xf32>
    %231 = tpu.reciprocal %230 {approx = true} : vector<8x1xf32> -> vector<8x1xf32>
    %232 = vector.broadcast %231 : vector<8x1xf32> to vector<8x8xf32>
    %233 = arith.mulf %228, %232 : vector<8x8xf32>
    %234 = arith.truncf %233 : vector<8x8xf32> to vector<8x8xbf16>
    %235 = vector.extract_strided_slice %163 {offsets = [0, 24], sizes = [8, 8], strides = [1, 1]} : vector<8x32xbf16> to vector<8x8xbf16>
    %cst_100 = arith.constant dense<0.000000e+00> : vector<8x8xf32>
    %236 = tpu.matmul %234, %235, %cst_100 {dimension_numbers = #tpu.dot_dimension_numbers<[1], [0], [0], [1], [0, 0, 1, 1], [], []>} : vector<8x8xbf16>, vector<8x8xbf16>, vector<8x8xf32> -> vector<8x8xf32>
    %c0_101 = arith.constant 0 : index
    %c24_102 = arith.constant 24 : index
    %237 = vector.load %arg20[%c0_101, %c24_102] : memref<8x32xf32, #tpu.memory_space<vmem>>, vector<8x8xf32>
    tpu.vector_store %arg20[%c0_101, %c24_102], %236 {strides = array<i32>} : memref<8x32xf32, #tpu.memory_space<vmem>>, vector<8x8xf32>,
    %c0_103 = arith.constant 0 : index
    %c0_104 = arith.constant 0 : index
    %238 = vector.load %arg20[%c0_103, %c0_104] : memref<8x32xf32, #tpu.memory_space<vmem>>, vector<8x32xf32>
    %239 = arith.truncf %238 : vector<8x32xf32> to vector<8x32xbf16>
    %c0_105 = arith.constant 0 : index
    %c224 = arith.constant 224 : index
    %c0_106 = arith.constant 0 : index
    %240 = vector.load %arg11[%c0_105, %c224, %c0_106] : memref<1x256x32xbf16, #tpu.memory_space<vmem>>, vector<1x32x32xbf16>
    %241 = vector.shape_cast %240 : vector<1x32x32xbf16> to vector<32x32xbf16>
    %cst_107 = arith.constant dense<0.000000e+00> : vector<8x32xf32>
    %242 = tpu.matmul %239, %241, %cst_107 {dimension_numbers = #tpu.dot_dimension_numbers<[1], [0], [0], [1], [0, 0, 1, 1], [], []>} : vector<8x32xbf16>, vector<32x32xbf16>, vector<8x32xf32> -> vector<8x32xf32>
    %c0_108 = arith.constant 0 : index
    %c7 = arith.constant 7 : index
    %c0_109 = arith.constant 0 : index
    %243 = vector.load %arg12[%c0_108, %c7, %c0_109] : memref<1x8x32xf32, #tpu.memory_space<vmem>>, vector<1x1x32xf32>
    %244 = vector.shape_cast %243 : vector<1x1x32xf32> to vector<1x32xf32>
    %245 = vector.broadcast %244 : vector<1x32xf32> to vector<8x32xf32>
    %246 = arith.addf %242, %245 : vector<8x32xf32>
    %247 = arith.addf %136, %246 : vector<8x32xf32>
    %c0_110 = arith.constant 0 : index
    %c2_111 = arith.constant 2 : index
    %c0_112 = arith.constant 0 : index
    %248 = vector.load %arg17[%c0_110, %c2_111, %c0_112] : memref<1x6x32xf32, #tpu.memory_space<vmem>>, vector<1x1x32xf32>
    %249 = vector.shape_cast %248 : vector<1x1x32xf32> to vector<1x32xf32>
    %c0_113 = arith.constant 0 : index
    %c3_114 = arith.constant 3 : index
    %c0_115 = arith.constant 0 : index
    %250 = vector.load %arg17[%c0_113, %c3_114, %c0_115] : memref<1x6x32xf32, #tpu.memory_space<vmem>>, vector<1x1x32xf32>
    %251 = vector.shape_cast %250 : vector<1x1x32xf32> to vector<1x32xf32>
    %cst_116 = arith.constant dense<0.000000e+00> : vector<8xf32>
    %252 = vector.multi_reduction <add>, %247, %cst_116 [1] : vector<8x32xf32> to vector<8xf32>
    %253 = vector.shape_cast %252 : vector<8xf32> to vector<8x1xf32>
    %cst_117 = arith.constant 3.125000e-02 : f32
    %254 = vector.broadcast %cst_117 : f32 to vector<8x1xf32>
    %255 = arith.mulf %253, %254 : vector<8x1xf32>
    %256 = vector.broadcast %255 : vector<8x1xf32> to vector<8x32xf32>
    %257 = arith.subf %247, %256 : vector<8x32xf32>
    %258 = arith.mulf %257, %257 : vector<8x32xf32>
    %cst_118 = arith.constant dense<0.000000e+00> : vector<8xf32>
    %259 = vector.multi_reduction <add>, %258, %cst_118 [1] : vector<8x32xf32> to vector<8xf32>
    %260 = vector.shape_cast %259 : vector<8xf32> to vector<8x1xf32>
    %cst_119 = arith.constant 3.125000e-02 : f32
    %261 = vector.broadcast %cst_119 : f32 to vector<8x1xf32>
    %262 = arith.mulf %260, %261 : vector<8x1xf32>
    %cst_120 = arith.constant 9.99999974E-6 : f32
    %263 = vector.broadcast %cst_120 : f32 to vector<8x1xf32>
    %264 = arith.addf %262, %263 : vector<8x1xf32>
    %265 = math.rsqrt %264 : vector<8x1xf32>
    %266 = vector.broadcast %265 : vector<8x1xf32> to vector<8x32xf32>
    %267 = arith.mulf %257, %266 : vector<8x32xf32>
    %268 = vector.broadcast %249 : vector<1x32xf32> to vector<8x32xf32>
    %269 = arith.mulf %267, %268 : vector<8x32xf32>
    %270 = vector.broadcast %251 : vector<1x32xf32> to vector<8x32xf32>
    %271 = arith.addf %269, %270 : vector<8x32xf32>
    %272 = arith.truncf %271 : vector<8x32xf32> to vector<8x32xbf16>
    %c0_121 = arith.constant 0 : index
    %c0_122 = arith.constant 0 : index
    %c0_123 = arith.constant 0 : index
    %273 = vector.load %arg13[%c0_121, %c0_122, %c0_123] : memref<1x32x128xbf16, #tpu.memory_space<vmem>>, vector<1x32x128xbf16>
    %274 = vector.shape_cast %273 : vector<1x32x128xbf16> to vector<32x128xbf16>
    %cst_124 = arith.constant dense<0.000000e+00> : vector<8x128xf32>
    %275 = tpu.matmul %272, %274, %cst_124 {dimension_numbers = #tpu.dot_dimension_numbers<[1], [0], [0], [1], [0, 0, 1, 1], [], []>} : vector<8x32xbf16>, vector<32x128xbf16>, vector<8x128xf32> -> vector<8x128xf32>
    %c0_125 = arith.constant 0 : index
    %c0_126 = arith.constant 0 : index
    %c0_127 = arith.constant 0 : index
    %276 = vector.load %arg14[%c0_125, %c0_126, %c0_127] : memref<1x1x128xf32, #tpu.memory_space<vmem>>, vector<1x1x128xf32>
    %277 = vector.shape_cast %276 : vector<1x1x128xf32> to vector<1x128xf32>
    %278 = vector.broadcast %277 : vector<1x128xf32> to vector<8x128xf32>
    %279 = arith.addf %275, %278 : vector<8x128xf32>
    %cst_128 = arith.constant 0.707106769 : f32
    %280 = vector.broadcast %cst_128 : f32 to vector<8x128xf32>
    %281 = arith.mulf %279, %280 : vector<8x128xf32>
    %282 = math.absf %281 : vector<8x128xf32>
    %cst_129 = arith.constant 0.327591091 : f32
    %283 = vector.broadcast %cst_129 : f32 to vector<8x128xf32>
    %284 = arith.mulf %283, %282 : vector<8x128xf32>
    %cst_130 = arith.constant 1.000000e+00 : f32
    %285 = vector.broadcast %cst_130 : f32 to vector<8x128xf32>
    %286 = arith.addf %285, %284 : vector<8x128xf32>
    %cst_131 = arith.constant 1.000000e+00 : f32
    %287 = vector.broadcast %cst_131 : f32 to vector<8x128xf32>
    %288 = arith.divf %287, %286 : vector<8x128xf32>
    %cst_132 = arith.constant 1.06140542 : f32
    %289 = vector.broadcast %cst_132 : f32 to vector<8x128xf32>
    %290 = arith.mulf %288, %289 : vector<8x128xf32>
    %cst_133 = arith.constant -1.45315206 : f32
    %291 = vector.broadcast %cst_133 : f32 to vector<8x128xf32>
    %292 = arith.addf %291, %290 : vector<8x128xf32>
    %293 = arith.mulf %288, %292 : vector<8x128xf32>
    %cst_134 = arith.constant 1.42141378 : f32
    %294 = vector.broadcast %cst_134 : f32 to vector<8x128xf32>
    %295 = arith.addf %294, %293 : vector<8x128xf32>
    %296 = arith.mulf %288, %295 : vector<8x128xf32>
    %cst_135 = arith.constant -0.284496725 : f32
    %297 = vector.broadcast %cst_135 : f32 to vector<8x128xf32>
    %298 = arith.addf %297, %296 : vector<8x128xf32>
    %299 = arith.mulf %288, %298 : vector<8x128xf32>
    %cst_136 = arith.constant 0.254829586 : f32
    %300 = vector.broadcast %cst_136 : f32 to vector<8x128xf32>
    %301 = arith.addf %300, %299 : vector<8x128xf32>
    %302 = arith.mulf %288, %301 : vector<8x128xf32>
    %cst_137 = arith.constant 0.000000e+00 : f32
    %303 = vector.broadcast %cst_137 : f32 to vector<8x128xf32>
    %304 = arith.subf %303, %282 : vector<8x128xf32>
    %305 = arith.mulf %304, %282 : vector<8x128xf32>
    %306 = math.exp %305 : vector<8x128xf32>
    %307 = arith.mulf %302, %306 : vector<8x128xf32>
    %cst_138 = arith.constant 1.000000e+00 : f32
    %308 = vector.broadcast %cst_138 : f32 to vector<8x128xf32>
    %309 = arith.subf %308, %307 : vector<8x128xf32>
    %cst_139 = arith.constant 0.000000e+00 : f32
    %310 = vector.broadcast %cst_139 : f32 to vector<8x128xf32>
    %311 = arith.cmpf oge, %281, %310 : vector<8x128xf32>
    %cst_140 = arith.constant 0.000000e+00 : f32
    %312 = vector.broadcast %cst_140 : f32 to vector<8x128xf32>
    %313 = arith.subf %312, %309 : vector<8x128xf32>
    %314 = arith.select %311, %309, %313 : vector<8x128xi1>, vector<8x128xf32>
    %cst_141 = arith.constant 5.000000e-01 : f32
    %315 = vector.broadcast %cst_141 : f32 to vector<8x128xf32>
    %316 = arith.mulf %315, %279 : vector<8x128xf32>
    %cst_142 = arith.constant 1.000000e+00 : f32
    %317 = vector.broadcast %cst_142 : f32 to vector<8x128xf32>
    %318 = arith.addf %317, %314 : vector<8x128xf32>
    %319 = arith.mulf %316, %318 : vector<8x128xf32>
    %320 = arith.truncf %319 : vector<8x128xf32> to vector<8x128xbf16>
    %c0_143 = arith.constant 0 : index
    %c0_144 = arith.constant 0 : index
    %c0_145 = arith.constant 0 : index
    %321 = vector.load %arg15[%c0_143, %c0_144, %c0_145] : memref<1x128x32xbf16, #tpu.memory_space<vmem>>, vector<1x128x32xbf16>
    %322 = vector.shape_cast %321 : vector<1x128x32xbf16> to vector<128x32xbf16>
    %cst_146 = arith.constant dense<0.000000e+00> : vector<8x32xf32>
    %323 = tpu.matmul %320, %322, %cst_146 {dimension_numbers = #tpu.dot_dimension_numbers<[1], [0], [0], [1], [0, 0, 1, 1], [], []>} : vector<8x128xbf16>, vector<128x32xbf16>, vector<8x32xf32> -> vector<8x32xf32>
    %c0_147 = arith.constant 0 : index
    %c0_148 = arith.constant 0 : index
    %c0_149 = arith.constant 0 : index
    %324 = vector.load %arg16[%c0_147, %c0_148, %c0_149] : memref<1x1x32xf32, #tpu.memory_space<vmem>>, vector<1x1x32xf32>
    %325 = vector.shape_cast %324 : vector<1x1x32xf32> to vector<1x32xf32>
    %326 = vector.broadcast %325 : vector<1x32xf32> to vector<8x32xf32>
    %327 = arith.addf %323, %326 : vector<8x32xf32>
    %328 = arith.addf %271, %327 : vector<8x32xf32>
    %c0_150 = arith.constant 0 : index
    %c4_151 = arith.constant 4 : index
    %c0_152 = arith.constant 0 : index
    %329 = vector.load %arg17[%c0_150, %c4_151, %c0_152] : memref<1x6x32xf32, #tpu.memory_space<vmem>>, vector<1x1x32xf32>
    %330 = vector.shape_cast %329 : vector<1x1x32xf32> to vector<1x32xf32>
    %c0_153 = arith.constant 0 : index
    %c5_154 = arith.constant 5 : index
    %c0_155 = arith.constant 0 : index
    %331 = vector.load %arg17[%c0_153, %c5_154, %c0_155] : memref<1x6x32xf32, #tpu.memory_space<vmem>>, vector<1x1x32xf32>
    %332 = vector.shape_cast %331 : vector<1x1x32xf32> to vector<1x32xf32>
    %cst_156 = arith.constant dense<0.000000e+00> : vector<8xf32>
    %333 = vector.multi_reduction <add>, %328, %cst_156 [1] : vector<8x32xf32> to vector<8xf32>
    %334 = vector.shape_cast %333 : vector<8xf32> to vector<8x1xf32>
    %cst_157 = arith.constant 3.125000e-02 : f32
    %335 = vector.broadcast %cst_157 : f32 to vector<8x1xf32>
    %336 = arith.mulf %334, %335 : vector<8x1xf32>
    %337 = vector.broadcast %336 : vector<8x1xf32> to vector<8x32xf32>
    %338 = arith.subf %328, %337 : vector<8x32xf32>
    %339 = arith.mulf %338, %338 : vector<8x32xf32>
    %cst_158 = arith.constant dense<0.000000e+00> : vector<8xf32>
    %340 = vector.multi_reduction <add>, %339, %cst_158 [1] : vector<8x32xf32> to vector<8xf32>
    %341 = vector.shape_cast %340 : vector<8xf32> to vector<8x1xf32>
    %cst_159 = arith.constant 3.125000e-02 : f32
    %342 = vector.broadcast %cst_159 : f32 to vector<8x1xf32>
    %343 = arith.mulf %341, %342 : vector<8x1xf32>
    %cst_160 = arith.constant 9.99999974E-6 : f32
    %344 = vector.broadcast %cst_160 : f32 to vector<8x1xf32>
    %345 = arith.addf %343, %344 : vector<8x1xf32>
    %346 = math.rsqrt %345 : vector<8x1xf32>
    %347 = vector.broadcast %346 : vector<8x1xf32> to vector<8x32xf32>
    %348 = arith.mulf %338, %347 : vector<8x32xf32>
    %349 = vector.broadcast %330 : vector<1x32xf32> to vector<8x32xf32>
    %350 = arith.mulf %348, %349 : vector<8x32xf32>
    %351 = vector.broadcast %332 : vector<1x32xf32> to vector<8x32xf32>
    %352 = arith.addf %350, %351 : vector<8x32xf32>
    %c0_161 = arith.constant 0 : index
    %c0_162 = arith.constant 0 : index
    %353 = vector.load %arg19[%c0_161, %c0_162] : memref<8x32xf32, #tpu.memory_space<vmem>>, vector<8x32xf32>
    tpu.vector_store %arg19[%c0_161, %c0_162], %352 {strides = array<i32>} : memref<8x32xf32, #tpu.memory_space<vmem>>, vector<8x32xf32>,
    %c1_i32 = arith.constant 1 : i32
    %354 = arith.cmpi eq, %arg1, %c1_i32 : i32
    %355 = arith.extui %354 : i1 to i32
    %c0_i32_163 = arith.constant 0 : i32
    %356 = arith.cmpi ne, %355, %c0_i32_163 : i32
    scf.if %356 {
      %c0_164 = arith.constant 0 : index
      %c0_165 = arith.constant 0 : index
      %357 = vector.load %arg10[%c0_164, %c0_165] : memref<16x32xbf16, #tpu.memory_space<vmem>>, vector<16x32xbf16>
      %358 = arith.truncf %352 : vector<8x32xf32> to vector<8x32xbf16>
      %cst_166 = arith.constant dense<0.000000e+00> : vector<16x8xf32>
      %359 = tpu.matmul %357, %358, %cst_166 {dimension_numbers = #tpu.dot_dimension_numbers<[1], [1], [0], [0], [0, 0, 1, 0], [], []>} : vector<16x32xbf16>, vector<8x32xbf16>, vector<16x8xf32> -> vector<16x8xf32>
      %cst_167 = arith.constant 1.41421354 : f32
      %360 = vector.broadcast %cst_167 : f32 to vector<16x8xf32>
      %361 = arith.mulf %359, %360 : vector<16x8xf32>
      %c0_168 = arith.constant 0 : index
      %c0_169 = arith.constant 0 : index
      %c0_170 = arith.constant 0 : index
      %362 = vector.load %arg18[%c0_168, %c0_169, %c0_170] : memref<1x16x8xf32, #tpu.memory_space<vmem>>, vector<1x16x8xf32>
      %363 = vector.shape_cast %362 : vector<1x16x8xf32> to vector<16x8xf32>
      %364 = vector.shape_cast %361 : vector<16x8xf32> to vector<1x16x8xf32>
      tpu.vector_store %arg18[%c0_168, %c0_169, %c0_170], %364 {strides = array<i32>} : memref<1x16x8xf32, #tpu.memory_space<vmem>>, vector<1x16x8xf32>,
    } else {
    }
    return
  }
  func.func @transform_0(%arg0: i32, %arg1: i32) -> (i32, i32, i32) {
    %c0_i32 = arith.constant 0 : i32
    %c0_i32_0 = arith.constant 0 : i32
    %c0_i32_1 = arith.constant 0 : i32
    return %arg0, %c0_i32, %c0_i32_0 : i32, i32, i32
  }
  func.func @transform_1(%arg0: i32, %arg1: i32) -> (i32, i32) {
    %c0_i32 = arith.constant 0 : i32
    %c0_i32_0 = arith.constant 0 : i32
    %c0_i32_1 = arith.constant 0 : i32
    return %c0_i32, %c0_i32_0 : i32, i32
  }
  func.func @transform_2(%arg0: i32, %arg1: i32) -> (i32, i32) {
    %c0_i32 = arith.constant 0 : i32
    %c0_i32_0 = arith.constant 0 : i32
    return %arg0, %c0_i32 : i32, i32
  }
  func.func @transform_3(%arg0: i32, %arg1: i32) -> (i32, i32, i32) {
    %c0_i32 = arith.constant 0 : i32
    %c0_i32_0 = arith.constant 0 : i32
    %c0_i32_1 = arith.constant 0 : i32
    return %arg0, %c0_i32, %c0_i32_0 : i32, i32, i32
  }
  func.func @transform_4(%arg0: i32, %arg1: i32) -> (i32, i32) {
    %c0_i32 = arith.constant 0 : i32
    %c0_i32_0 = arith.constant 0 : i32
    %c0_i32_1 = arith.constant 0 : i32
    return %c0_i32, %c0_i32_0 : i32, i32
  }
  func.func @transform_5(%arg0: i32, %arg1: i32) -> (i32, i32) {
    %c0_i32 = arith.constant 0 : i32
    %c0_i32_0 = arith.constant 0 : i32
    %c0_i32_1 = arith.constant 0 : i32
    return %c0_i32, %c0_i32_0 : i32, i32
  }
  func.func @transform_6(%arg0: i32, %arg1: i32) -> (i32, i32) {
    %c0_i32 = arith.constant 0 : i32
    %c0_i32_0 = arith.constant 0 : i32
    %c0_i32_1 = arith.constant 0 : i32
    return %c0_i32, %c0_i32_0 : i32, i32
  }
  func.func @transform_7(%arg0: i32, %arg1: i32) -> (i32, i32) {
    %c0_i32 = arith.constant 0 : i32
    %c0_i32_0 = arith.constant 0 : i32
    %c0_i32_1 = arith.constant 0 : i32
    return %c0_i32, %c0_i32_0 : i32, i32
  }
  func.func @transform_8(%arg0: i32, %arg1: i32) -> (i32, i32) {
    %c0_i32 = arith.constant 0 : i32
    %c0_i32_0 = arith.constant 0 : i32
    %c0_i32_1 = arith.constant 0 : i32
    return %c0_i32, %c0_i32_0 : i32, i32
  }
  func.func @transform_9(%arg0: i32, %arg1: i32) -> (i32, i32, i32) {
    %c0_i32 = arith.constant 0 : i32
    %c0_i32_0 = arith.constant 0 : i32
    %c0_i32_1 = arith.constant 0 : i32
    return %arg1, %c0_i32, %c0_i32_0 : i32, i32, i32
  }
  func.func @transform_10(%arg0: i32, %arg1: i32) -> (i32, i32, i32) {
    %c0_i32 = arith.constant 0 : i32
    %c0_i32_0 = arith.constant 0 : i32
    %c0_i32_1 = arith.constant 0 : i32
    return %arg1, %c0_i32, %c0_i32_0 : i32, i32, i32
  }
  func.func @transform_11(%arg0: i32, %arg1: i32) -> (i32, i32, i32) {
    %c0_i32 = arith.constant 0 : i32
    %c0_i32_0 = arith.constant 0 : i32
    %c0_i32_1 = arith.constant 0 : i32
    return %arg1, %c0_i32, %c0_i32_0 : i32, i32, i32
  }
  func.func @transform_12(%arg0: i32, %arg1: i32) -> (i32, i32, i32) {
    %c0_i32 = arith.constant 0 : i32
    %c0_i32_0 = arith.constant 0 : i32
    %c0_i32_1 = arith.constant 0 : i32
    return %arg1, %c0_i32, %c0_i32_0 : i32, i32, i32
  }
  func.func @transform_13(%arg0: i32, %arg1: i32) -> (i32, i32, i32) {
    %c0_i32 = arith.constant 0 : i32
    %c0_i32_0 = arith.constant 0 : i32
    %c0_i32_1 = arith.constant 0 : i32
    return %arg1, %c0_i32, %c0_i32_0 : i32, i32, i32
  }
  func.func @transform_14(%arg0: i32, %arg1: i32) -> (i32, i32, i32) {
    %c0_i32 = arith.constant 0 : i32
    %c0_i32_0 = arith.constant 0 : i32
    %c0_i32_1 = arith.constant 0 : i32
    return %arg1, %c0_i32, %c0_i32_0 : i32, i32, i32
  }
  func.func @transform_15(%arg0: i32, %arg1: i32) -> (i32, i32, i32) {
    %c0_i32 = arith.constant 0 : i32
    %c0_i32_0 = arith.constant 0 : i32
    %c0_i32_1 = arith.constant 0 : i32
    return %arg1, %c0_i32, %c0_i32_0 : i32, i32, i32
  }
  func.func @transform_16(%arg0: i32, %arg1: i32) -> (i32, i32, i32) {
    %c0_i32 = arith.constant 0 : i32
    %c0_i32_0 = arith.constant 0 : i32
    %c0_i32_1 = arith.constant 0 : i32
    return %arg0, %c0_i32, %c0_i32_0 : i32, i32, i32
  }
}

</mosaic_0001>

<bundles_post_ra>
// kernel: tpu_custom_call.1
= control target key start
LH: loop header
LB: loop body
LE: loop exit
PB: predicated region body
PF: predicated region fallthrough
CT: control target
= control target key end

     0   :  { %s4451_s0 = inlined_call_operand.vmem [shape: f32[2,8,16], index: 0, kind: input, shape index: {}]   ;;  %s4452_s1 = inlined_call_operand.vmem [shape: f32[2,1], index: 1, kind: input, shape index: {}]   ;;  %s4453_s2 = inlined_call_operand.vmem [shape: f32[16,32], index: 2, kind: input, shape index: {}]   ;;  %s4454_s3 = inlined_call_operand.vmem [shape: f32[2,1,8], index: 3, kind: input, shape index: {}]   ;;  %s4455_s4 = inlined_call_operand.vmem [shape: f32[1,128], index: 4, kind: input, shape index: {}]   ;;  %s4456_s5 = inlined_call_operand.vmem [shape: bf16[256,32], index: 5, kind: input, shape index: {}]   ;;  %s4457_s6 = inlined_call_operand.vmem [shape: bf16[32,32], index: 6, kind: input, shape index: {}]   ;;  %s4458_s7 = inlined_call_operand.vmem [shape: bf16[16,32], index: 7, kind: input, shape index: {}]   ;;  %s4459_s8 = inlined_call_operand.vmem [shape: bf16[16,32], index: 8, kind: input, shape index: {}]   ;;  %s4460_s9 = inlined_call_operand.vmem [shape: bf16[2,256,32], index: 9, kind: input, shape index: {}]   ;;  %s4461_s10 = inlined_call_operand.vmem [shape: f32[2,8,32], index: 10, kind: input, shape index: {}]   ;;  %s4462_s11 = inlined_call_operand.vmem [shape: bf16[2,32,128], index: 11, kind: input, shape index: {}]   ;;  %s4463_s12 = inlined_call_operand.vmem [shape: f32[2,1,128], index: 12, kind: input, shape index: {}]   ;;  %s4464_s13 = inlined_call_operand.vmem [shape: bf16[2,128,32], index: 13, kind: input, shape index: {}]   ;;  %s4465_s14 = inlined_call_operand.vmem [shape: f32[2,1,32], index: 14, kind: input, shape index: {}]   ;;  %s4466_s15 = inlined_call_operand.vmem [shape: f32[2,6,32], index: 15, kind: input, shape index: {}]   ;;  %s4467_s16 = inlined_call_operand.vmem [shape: f32[2,16,8], index: 16, kind: output, shape index: {}]  }
   0x1   :  { %4473 = sst [smem:[#allocation13_spill]] %s4451_s0 }
   0x2   :  { %4474 = sst [smem:[#allocation14_spill]] %s4452_s1 }
   0x3   :  { %4475 = sst [smem:[#allocation15_spill]] %s4453_s2 }
   0x4   :  { %4476 = sst [smem:[#allocation16_spill]] %s4454_s3 }
   0x5   :  { %4477 = sst [smem:[#allocation17_spill]] %s4455_s4 }
   0x6   :  { %4478 = sst [smem:[#allocation18_spill]] %s4457_s6 }
   0x7   :  { %4479 = sst [smem:[#allocation19_spill]] %s4458_s7 }
   0x8   :  { %4480 = sst [smem:[#allocation20_spill]] %s4459_s8 }
   0x9   :  { %4481 = sst [smem:[#allocation21_spill]] %s4460_s9 }
   0xa   :  { %4482 = sst [smem:[#allocation22_spill]] %s4461_s10 }
   0xb   :  { %21 = vsyncpa [#allocation5], 0  ;;  %s3955_s21 = smov 0   ;;  %s3957_s22 = smov 0  }
   0xc   :  { %s3959_s23 = smov 0   ;;  %s3961_s24 = smov 0  }
   0xd   :  { %s3963_s25 = smov 0  }
   0xe LB: > { %4483 = sst [smem:[#allocation7_spill]] %s3837_s22  ;;  %s3186_s26 = sadd.s32 4294967295, %s3849_s25   ;;  %s3849_s25 = sphi %s3963_s25, %s27_s25   ;;  %s3845_s24 = sphi %s3961_s24, %s4510_s24   ;;  %s3841_s23 = sphi %s3959_s23, %s4509_s23   ;;  %s3837_s22 = sphi %s3957_s22, %s4508_s22   ;;  %s3833_s21 = sphi %s3955_s21, %s4507_s21  }
   0xf   : > { %4484 = sst [smem:[#allocation8_spill]] %s3841_s23  ;;  %s36_s27 = sadd.s32 1, %s3841_s23 }
  0x10   : > { %4485 = sst [smem:[#allocation9_spill]] %s3845_s24  ;;  %p37_p0 = scmp.ge.s32.totalorder %s36_s27, 2 }
  0x11   : > { %4486 = sst [smem:[#allocation10_spill]] %s3849_s25  ;;  %s39_s28 = sadd.s32 1, %s3845_s24 }
  0x12   : > { %p3188_p1 = scmp.ge.s32.totalorder %s3849_s25, 1  ;;  %p456_p2 = scmp.lt.s32.totalorder %s3849_s25, 5 }
  0x13   : > { %s4512_s27 = smov (%p37_p0, %s36_s27), 0  ;;  %s4514_s28 = smov (!%p37_p0, %s39_s28), %s3845_s24 }
  0x14   : > { %4487 = sst [smem:[#allocation11_spill]] %s4512_s27  ;;  %p3988_p3 = pnand %p3188_p1, %p456_p2 }
  0x15   : > { %p41_p4 = scmp.ge.s32.totalorder %s4514_s28, 2  ;;  %p3992_p5 = scmp.eq.s32.totalorder %s3186_s26, 0 }
  0x16   : > { %p3629_p6 = pneg %p3988_p3  ;;  %s4490_s1 = sld [smem:[#allocation14_spill]] }
  0x17   : > { %s4516_s28 = smov (%p41_p4, %s4514_s28), 0 }
  0x18   : > { %4491 = sst [smem:[#allocation12_spill]] %s4516_s28  ;;  %p3630_p7 = pnand %p3992_p5, %p3629_p6 }
  0x1a   : > { %p3794_p9 = pneg %p3630_p7 }
  0x1c   : > { %s469_s18 = sshll.u32 %s4490_s1, 4  ;;  %s470_s18 = int_to_ptr.vmem [resolvable:$true] %s469_s18 }
  0x1d   : > { %s3792_s19 = scalar_lea.vmem %s470_s18, 32  ;;  %p3800_p12 = scmp.lt.s32.totalorder %s470_s18, %s470_s18 }
  0x1e   : > { %p3793_p8 = scmp.ne.s32.totalorder %s470_s18, %s3792_s19  ;;  %p3801_p13 = scmp.lt.s32.totalorder %s3792_s19, %s3792_s19 }
  0x20   : > { %p3795_p10 = pnand %p3794_p9, %p3793_p8  ;;  %p3802_p0 = por %p3801_p13, %p3800_p12 }
  0x22   : > { %p3796_p11 = pneg %p3795_p10 }
  0x24   : > { %p3803_p1 = pnand %p3802_p0, %p3796_p11 }
  0x26   : > { %3806 = shalt.err (!%p3803_p1)
}
  0x27   : > { %s3851_s20 = smov [#allocation4]   ;;  %567 = sbr.rel (%p3988_p3) target bundleno = 5175 (0x1437), region = 84 }
  0x28   : > { %3632 = dma.vmem_to_smem (!%p3630_p7), %s470_s18, 32, %s3851_s20, [#allocation5]  }
  0x2e   : > { %3828 = dma.done.wait (%p3992_p5), [#allocation5], 32  }
  0x2f   : > { %3830 = vsyncadd (%p3992_p5), [#allocation5], 4294967264 }
  0x30   : > { %573 = sfence }
  0x31   : > { %p653_p2 = scmp.lt.s32.totalorder %s3837_s22, 1  ;;  %p664_p4 = scmp.lt.s32.totalorder %s3833_s21, 1 }
  0x32   : > { %s4493_s1 = sld [smem:[#allocation13_spill]]  ;;  %s4494_s2 = sld [smem:[#allocation15_spill]] }
  0x33   : > { %s4014_s26 = scalar_select %p653_p2, %s3837_s22, 1 }
  0x34   : > { %s4017_s0 = scalar_select %p664_p4, %s3833_s21, 1 }
  0x35   : > { %s3193_s29 = sshll.u32 %s4014_s26, 3  ;;  %s4495_s9 = sld [smem:[#allocation21_spill]] }
  0x36   : > { %s3310_s25 = sshll.u32 %s4017_s0, 7  ;;  %s3197_s8 = sshll.u32 %s4017_s0, 3 }
  0x37   : > { %s4496_s10 = sld [smem:[#allocation22_spill]]  ;;  %s3311_s19 = sshll.u32 %s4017_s0, 4 }
  0x38   : > { %s4027_s28 = scalar_lea.vmem %s4493_s1, %s3193_s29  ;;  %s4032_s23 = scalar_lea.vmem %s4494_s2, %s3193_s29 }
  0x39   : > { %s4054_s29 = scalar_lea.vmem %s4462_s11, %s3311_s19  ;;  %s3312_s2 = sshll.u32 %s4017_s0, 6 }
  0x3a   : > { %s4060_s7 = scalar_lea.vmem %s4464_s13, %s3312_s2  ;;  %s4069_s1 = scalar_lea.vmem %s4466_s15, %s3197_s8 }
  0x3b   : > { %s4039_s4 = scalar_lea.vmem %s4495_s9, %s3310_s25  ;;  %s3313_s20 = sshll.u32 %s4014_s26, 4 }
  0x3c   : > { %s4075_s19 = scalar_lea.vmem %s4467_s16, %s3313_s20  ;;  %p3205_p3 = scmp.ne.s32.totalorder %s3833_s21, 0 }
  0x3d   : > { %s4044_s17 = scalar_lea.vmem %s4496_s10, %s3197_s8  ;;  %s4497_s27 = sld [smem:[#allocation7_spill]] (!%p3205_p3)  ;;  %v3694_v0 = vld [vmem:[%s4456_s5 + $0x40] sm:$0xff] (!%p3205_p3)   ;;  %v3696_v2 = vld [vmem:[%s4456_s5 + $0x48] sm:$0xff] (!%p3205_p3)   ;;  %v3698_v4 = vld [vmem:[%s4456_s5 + $0x50] sm:$0xff] (!%p3205_p3)   ;;  %v3852_v32 = vmov (!%p3205_p3), 683565275  }
  0x3e   : > { %702 = sbr.rel (%p3205_p3) target bundleno = 638 (0x27e), region = 92  ;;  %v3695_v1 = vld [vmem:[%s4456_s5] sm:$0xff] (!%p3205_p3)   ;;  %3314 = vmatprep.subr.bf16.mxu0 (!%p3205_p3), %v3694_v0  ;;  %v3697_v3 = vld [vmem:[%s4456_s5 + $0x8] sm:$0xff] (!%p3205_p3)   ;;  %v3699_v5 = vld [vmem:[%s4456_s5 + $0x10] sm:$0xff] (!%p3205_p3)   ;;  %v3853_v34 = vmov (!%p3205_p3), 2475754826  }
  0x3f   : > { %3315 = vmatpush3.bf16.msra.mxu0 (!%p3205_p3), %v3695_v1  ;;  %v3700_v6 = vld [vmem:[%s4456_s5 + $0x58] sm:$0xff] (!%p3205_p3)   ;;  %v3702_v8 = vld [vmem:[%s4456_s5 + $0x60] sm:$0xff] (!%p3205_p3)   ;;  %v3704_v12 = vld [vmem:[%s4456_s5 + $0x68] sm:$0xff] (!%p3205_p3)   ;;  %v3854_v36 = vmov (!%p3205_p3), 2131351028   ;;  %s4500_s2 = sld [smem:[#allocation19_spill]] (!%p3205_p3) }
  0x40   : > { %3316 = vmatprep.subr.bf16.mxu0 (!%p3205_p3), %v3696_v2  ;;  %v3701_v7 = vld [vmem:[%s4456_s5 + $0x18] sm:$0xff] (!%p3205_p3)   ;;  %v3703_v11 = vld [vmem:[%s4456_s5 + $0x20] sm:$0xff] (!%p3205_p3)   ;;  %v3705_v15 = vld [vmem:[%s4456_s5 + $0x28] sm:$0xff] (!%p3205_p3)   ;;  %v3855_v38 = vmov (!%p3205_p3), 2102212464  }
  0x41   : > { %v3706_v16 = vld [vmem:[%s4456_s5 + $0x70] sm:$0xff] (!%p3205_p3)   ;;  %v3708_v23 = vld [vmem:[%s4456_s5 + $0x78] sm:$0xff] (!%p3205_p3)   ;;  %v3856_v40 = vmov (!%p3205_p3), 920167782   ;;  %v3857_v47 = vmov (!%p3205_p3), 1326507024  }
  0x42   : > { %v3707_v20 = vld [vmem:[%s4456_s5 + $0x30] sm:$0xff] (!%p3205_p3)   ;;  %v3709_v26 = vld [vmem:[%s4456_s5 + $0x38] sm:$0xff] (!%p3205_p3)  }
  0x43   : > { %s3206_s6 = sshll.u32 (!%p3205_p3), %s4497_s27, 7  ;;  %3317 = vmatpush3.bf16.msra.mxu0 (!%p3205_p3), %v3697_v3 }
  0x44   : > { %s704_s8 = sld [smem:[#allocation4 + %s3206_s6]] (!%p3205_p3)  ;;  %3318 = vmatprep.subr.bf16.mxu0 (!%p3205_p3), %v3698_v4 }
  0x47   : > { %3319 = vmatpush3.bf16.msra.mxu0 %v3699_v5 }
  0x48   : > { %3320 = vmatprep.subr.bf16.mxu0 %v3700_v6 }
  0x4a   : > { %s1153_s6 = smul.f32 %s704_s8, %s704_s8  ;;  %s1154_s25 = ssub.f32 1.0, %s704_s8  ;;  %v706_v10 = vstv %s704_s8 }
  0x4b   : > { %3321 = vmatpush3.bf16.msra.mxu0 %v3701_v7 }
  0x4c   : > { %s1155_s10 = smul.f32 %s1154_s25, %s1154_s25  ;;  %3322 = vmatprep.subr.bf16.mxu0 %v3702_v8 }
  0x4e   : > { %s1156_s24 = sadd.f32 %s1155_s10, %s1153_s6  ;;  %s4498_s10 = sld [smem:[#allocation17_spill]] }
  0x4f   : > { %3323 = vmatpush3.bf16.msra.mxu0 %v3703_v11 }
  0x50   : > { %v1157_v9 = vstv %s1156_s24  ;;  %3324 = vmatprep.subr.bf16.mxu0 %v3704_v12 }
  0x51   : > { %3713 = vrsqrt.f32 %v1157_v9 }
  0x53   : > { %3325 = vmatpush3.bf16.msra.mxu0 %v3705_v15 }
  0x54   : > { %v705_v13 = vld [vmem:[%s4498_s10] sm:$0x1]  ;;  %3326 = vmatprep.subr.bf16.mxu0 %v3706_v16  ;;  %s4499_s10 = sld [smem:[#allocation18_spill]] }
  0x55   : > { %v4115_v14 = vmul.f32 %v706_v10, %v705_v13 }
  0x57   : > { %v711_v17 = vand.u32 2139095040, %v4115_v14  ;;  %v708_v19 = vand.u32 2147483647, %v4115_v14  ;;  %3327 = vmatpush3.bf16.msra.mxu0 %v3707_v20  ;;  %vm710_vm7 = vcmp.lt.s32.totalorder %v4115_v14, 0  ;;  %vm800_vm15 = vweird.f32 %v4115_v14 }
  0x58   : > { %3328 = vmatprep.subr.bf16.mxu0 %v3708_v23 }
  0x59   : > { %v712_v18 = vshrl.u32 %v711_v17, 23  ;;  %v715_v25 = vand.u32 8388607, %v708_v19  ;;  %vm709_vm8 = vcmp.le.f32.partialorder %v708_v19, 0.7853982 }
  0x5b   : > { %v3207_v21 = vadd.s32 4294967169, %v712_v18  ;;  %v3714_v22 = vpop.eup %3713  ;;  %v716_v29 = vor.u32 8388608, %v715_v25  ;;  %3329 = vmatpush3.bf16.msra.mxu0 %v3709_v26 }
  0x5c   : > { %3623 = vpush %v3714_v22 }
  0x5d   : > { %v718_v24 = vadd.s32 1, %v3207_v21  ;;  %v756_v49 = vshll.u32 %v716_v29, 8 }
  0x5f   : > { %vm719_vm0 = vcmp.gt.s32.totalorder %v718_v24, 0 }
  0x60   : > { %v720_v27 = vsel %vm719_vm0, %v718_v24, 0  ;;  %vm3859_vm0 = vmmov 0  }
  0x61   : > { %v722_v28 = vand.u32 31, %v720_v27  ;;  %v721_v30 = vshrl.u32 %v720_v27, 5 }
  0x63   : > { %v723_v31 = vsub.s32 32, %v722_v28  ;;  %v725_v33 = vshll.u32 %v3852_v32, %v722_v28  ;;  %v728_v35 = vshll.u32 %v3853_v34, %v722_v28  ;;  %v731_v37 = vshll.u32 %v3854_v36, %v722_v28 }
  0x64   : > { %v734_v39 = vshll.u32 %v3855_v38, %v722_v28  ;;  %v737_v41 = vshll.u32 %v3856_v40, %v722_v28  ;;  %vm740_vm1 = vcmp.lt.s32.totalorder %v721_v30, 1  ;;  %vm743_vm2 = vcmp.lt.s32.totalorder %v721_v30, 4 }
  0x65   : > { %v724_v42 = vshrl.u32 %v3852_v32, %v723_v31  ;;  %v726_v43 = vshrl.u32 %v3853_v34, %v723_v31  ;;  %v729_v44 = vshrl.u32 %v3854_v36, %v723_v31  ;;  %v732_v45 = vshrl.u32 %v3855_v38, %v723_v31 }
  0x66   : > { %v735_v46 = vshrl.u32 %v3856_v40, %v723_v31  ;;  %v738_v48 = vshrl.u32 %v3857_v47, %v723_v31  ;;  %vm741_vm3 = vcmp.lt.s32.totalorder %v721_v30, 2  ;;  %vm742_vm4 = vcmp.lt.s32.totalorder %v721_v30, 3 }
  0x67   : > { %v727_v50 = vor.u32 %v726_v43, %v725_v33  ;;  %v730_v51 = vor.u32 %v729_v44, %v728_v35  ;;  %v733_v52 = vor.u32 %v732_v45, %v731_v37 }
  0x68   : > { %v736_v53 = vor.u32 %v735_v46, %v734_v39  ;;  %v739_v54 = vor.u32 %v738_v48, %v737_v41 }
  0x69   : > { %v744_v55 = vsel %vm740_vm1, %v724_v42, %v727_v50  ;;  %v745_v56 = vsel %vm743_vm2, %v733_v52, 2102212464  ;;  %v748_v57 = vsel %vm740_vm1, %v727_v50, %v730_v51  ;;  %v752_v58 = vsel %vm740_vm1, %v730_v51, %v733_v52 }
  0x6a   : > { %v746_v59 = vsel %vm742_vm4, %v730_v51, %v745_v56  ;;  %v749_v60 = vsel %vm743_vm2, %v736_v53, 920167782  ;;  %v753_v61 = vsel %vm743_vm2, %v739_v54, 1326507024  ;;  %v3710_v56 = vld [vmem:[%s4499_s10] sm:$0xff]   ;;  %vm1109_vm1 = vcmask 261120  }
  0x6b   : > { %v750_v62 = vsel %vm742_vm4, %v733_v52, %v749_v60  ;;  %v754_v63 = vsel %vm742_vm4, %v736_v53, %v753_v61  ;;  %v747_v0 = vsel %vm741_vm3, %v744_v55, %v746_v59  ;;  %vm1176_vm2 = vcmask 130048  }
  0x6c   : > { %v751_v1 = vsel %vm741_vm3, %v748_v57, %v750_v62  ;;  %v755_v2 = vsel %vm741_vm3, %v752_v58, %v754_v63  ;;  %v763_v7 = vmul.u32 %v756_v49, %v747_v0  ;;  %v3858_v57 = vmov 0.0  }
  0x6d   : > { %v4136_v3 = vmul.u32.u64.low %v756_v49, %v755_v2  ;;  %v4137_v4 = vmul.u32.u64.high %v756_v49, %v755_v2, %v4136_v3  ;;  %v4139_v5 = vmul.u32.u64.low %v756_v49, %v751_v1  ;;  %v4140_v6 = vmul.u32.u64.high %v756_v49, %v751_v1, %v4139_v5  ;;  %3411 = vmatprep.subr.bf16.mxu1 %v3858_v57  ;;  %3415 = vmatprep.mubr.msk.bf16.mxu1 %vm3859_vm0, %v3858_v57 }
  0x6e   : > { %3412 = vmatpush3.bf16.msra.mxu1 %v3710_v56 }
  0x6f   : > { %vm765_vm5 = vc.u32 %v4137_v4, %v4139_v5  ;;  %v766_v8 = vadd.s32 1, %v4140_v6  ;;  %v764_v21 = vadd.s32 %v4139_v5, %v4137_v4  ;;  %3413 = vmatprep.subr.bf16.mxu1 %v3858_v57  ;;  %v3712_v4 = vld [vmem:[%s4500_s2] sm:$0xff]  }
  0x70   : > { %v1160_v5 = vld [vmem:[%s4027_s28] sm:$0xff] }
  0x71   : > { %v767_v9 = vsel %vm765_vm5, %v766_v8, %v4140_v6 }
  0x72   : > { %v768_v10 = vadd.s32 %v767_v9, %v763_v7 }
  0x74   : > { %v769_v11 = vadd.s32 536870912, %v768_v10 }
  0x76   : > { %v770_v12 = vshrl.u32 %v769_v11, 30 }
  0x78   : > { %v771_v13 = vshll.u32 %v770_v12, 30  ;;  %v794_v33 = vsub.s32 4, %v770_v12 }
  0x7a   : > { %v772_v15 = vsub.s32 %v768_v10, %v771_v13  ;;  %v795_v36 = vsel %vm710_vm7, %v794_v33, %v770_v12  ;;  %v1166_v10 = vlaneseq }
  0x7b   : > { %v797_v39 = vsel %vm709_vm8, 0, %v795_v36 }
  0x7c   : > { %v774_v16 = vsub.s32 0, %v772_v15  ;;  %v904_v40 = vadd.s32 3, %v797_v39  ;;  %v801_v41 = vand.u32 3, %v797_v39  ;;  %v1167_v11 = vshrl.u32 %v1166_v10, 7 }
  0x7e   : > { %v3208_v17 = vmin.u32 %v774_v16, %v772_v15  ;;  %v905_v42 = vand.u32 3, %v904_v40  ;;  %vm806_vm9 = vcmp.eq.s32.totalorder %v801_v41, 2  ;;  %vm803_vm11 = vcmp.eq.s32.totalorder %v801_v41, 0 }
  0x7f   : > { %vm802_vm13 = vcmp.lt.s32.totalorder %v801_v41, 2  ;;  %v1168_v16 = vsub.s32 0, %v1167_v11 }
  0x80   : > { %v776_v18 = vclz %v3208_v17  ;;  %vm910_vm10 = vcmp.eq.s32.totalorder %v905_v42, 2  ;;  %vm907_vm12 = vcmp.eq.s32.totalorder %v905_v42, 0  ;;  %vm906_vm14 = vcmp.lt.s32.totalorder %v905_v42, 2 }
  0x82   : > { %v3209_v20 = vadd.s32 4294967294, %v776_v18 }
  0x84   : > { %vm3210_vm6 = vcmp.lt.s32.totalorder %v3209_v20, 0 }
  0x85   : > { %v779_v22 = vsel %vm3210_vm6, 0, %v3209_v20 }
  0x86   : > { %v780_v23 = vsub.s32 32, %v779_v22  ;;  %v781_v24 = vshll.u32 %v772_v15, %v779_v22  ;;  %v784_v25 = vsub.s32 4294967266, %v779_v22 }
  0x88   : > { %v782_v26 = vshrl.u32 %v764_v21, %v780_v23  ;;  %v785_v27 = vadd.s32 127, %v784_v25 }
  0x8a   : > { %v783_v28 = vor.u32 %v782_v26, %v781_v24  ;;  %v786_v29 = vshll.u32 %v785_v27, 23 }
  0x8c   : > { %v787_v30 = vor.u32 4788187, %v786_v29  ;;  %v790_v31 = vcvt.s32.f32 %v783_v28 }
  0x8d   : > { %s3624_s18 = spop %3623 }
  0x8e   : > { %v788_v32 = vand.u32 2147483647, %v787_v30  ;;  %v1161_v6 = vstv %s3624_s18 }
  0x8f   : > { %v1162_v8 = vmul.f32 %v1161_v6, %v1160_v5 }
  0x90   : > { %v791_v34 = vmul.f32 %v790_v31, %v788_v32 }
  0x91   : > { %v1163_v9 = vpack.c.bf16 %v1162_v8, %v1162_v8 }
  0x92   : > { %v792_v35 = vxor.u32 2147483648, %v791_v34 }
  0x94   : > { %v793_v37 = vsel %vm710_vm7, %v792_v35, %v791_v34 }
  0x95   : > { %v796_v38 = vsel %vm709_vm8, %v4115_v14, %v793_v37  ;;  %v3711_v14 = vld [vmem:[%s4499_s10 + $0x8] sm:$0xff]  }
  0x96   : > { %3715 = vcosq.f32 %v796_v38  ;;  %3414 = vmatpush3.bf16.msra.mxu1 %v3711_v14 }
  0x97   : > { %3717 = vsinq.f32 %v796_v38  ;;  %3419 = vmatprep.subr.bf16.mxu1 %v3858_v57 }
  0xa0   : > { %v3716_v43 = vpop.eup %3715 }
  0xa1   : > { %v3718_v44 = vpop.eup %3717  ;;  %v807_v45 = vxor.u32 2147483648, %v3716_v43 }
  0xa2   : > { %v804_v19 = vxor.u32 2147483648, %v3718_v44 }
  0xa3   : > { %v808_v46 = vsel %vm806_vm9, %v807_v45, %v3718_v44  ;;  %v912_v47 = vsel %vm910_vm10, %v807_v45, %v3718_v44 }
  0xa4   : > { %v805_v48 = vsel %vm803_vm11, %v3716_v43, %v804_v19  ;;  %v909_v49 = vsel %vm907_vm12, %v3716_v43, %v804_v19 }
  0xa5   : > { %v809_v50 = vsel %vm802_vm13, %v805_v48, %v808_v46  ;;  %v913_v51 = vsel %vm906_vm14, %v909_v49, %v912_v47 }
  0xa6   : > { %v810_v52 = vsel %vm800_vm15, nan, %v809_v50  ;;  %v914_v53 = vsel %vm800_vm15, nan, %v913_v51 }
  0xa7   : > { %v915_v54 = vpack.c.bf16 %v810_v52, %v810_v52  ;;  %v916_v55 = vpack.c.bf16 %v914_v53, %v914_v53 }
  0xa9   : > { %1077 = vmatprep.mubr.bf16.mxu0 %v916_v55 }
  0xaa   : > { %1078 = vmatmul.mubr.bf16.vlgmr.msra.gmra.mrb[0].mxu0 %v915_v54 }
 0x17d   : > { %v3330_v58 = vpop.f32.mrb[0].mxu0 }
 0x17e   : > { %v3331_v59 = vpop.f32.mrb[1].mxu0 }
 0x17f   : > { %v3332_v60 = vadd.f32 %v3331_v59, %v3330_v58  ;;  %v3333_v61 = vpop.f32.mrb[2].mxu0 }
 0x180   : > { %v3334_v62 = vpop.f32.mrb[3].mxu0 }
 0x181   : > { %v3231_v63 = vmul.f32 -1.442695, %v3332_v60 }
 0x183   : > { %3719 = vpow2.f32 %v3231_v63 }
 0x18d   : > { %v3720_v0 = vpop.eup %3719 }
 0x18e   : > { %v1088_v1 = vadd.f32 1.0, %v3720_v0 }
 0x190   : > { %3721 = vrcp.f32 %v1088_v1 }
 0x19a   : > { %v3722_v2 = vpop.eup %3721 }
 0x19b   : > { %v1091_v3 = vmul.f32 %v3722_v2, %v3332_v60 }
 0x19d   : > { %v1092_v7 = vpack.c.bf16 %v1091_v3, %v1091_v3 }
 0x19f   : > { %3416 = vmatmul.mubr.msk.bf16.vlgmr.msra.gmra.mrb[0].mxu1 %vm1109_vm1, %v1092_v7 }
 0x1a0   : > { %3420 = vmatpush3.bf16.msra.mxu1 %v3712_v4  ;;  %3421 = vmatprep.mubr.msk.bf16.mxu1 %vm3859_vm0, %v3858_v57 }
 0x1a7   : > { %3422 = vmatmul.mubr.msk.bf16.vlgmr.msra.gmra.mrb[4].mxu1 %vm1176_vm2, %v1163_v9 }
 0x272   : > { %v1147_v12 = vpop.f32.mrb[0].mxu1 }
 0x273   : > { %v3417_v13 = vpop.f32.mrb[1].mxu1  ;;  %v1169_v18 = vrot.slane %v1147_v12, %v1168_v16 }
 0x274   : > { %v1150_v15 = vpop.f32.mrb[2].mxu1 }
 0x275   : > { %v3418_v17 = vpop.f32.mrb[3].mxu1 }
 0x27a   : > { %v1214_v20 = vpop.f32.mrb[4].mxu1 }
 0x27b   : > { %v1215_v21 = vadd.f32 %v1214_v20, %v1169_v18  ;;  %v3423_v22 = vpop.f32.mrb[5].mxu1 }
 0x27c   : > { %v1217_v23 = vpop.f32.mrb[6].mxu1 }
 0x27d   : > { %1220 = vst.msk [vmem:[#allocation2] sm:$0xff] %vm1109_vm1, %v1215_v21  ;;  %v3424_v24 = vpop.f32.mrb[7].mxu1 }
 0x27e PF: > { %v3723_v25 = vld [vmem:[%s4039_s4] sm:$0xff]   ;;  %v3860_v26 = vmov 0.0   ;;  %v3724_v27 = vld [vmem:[%s4039_s4 + $0x8] sm:$0xff]   ;;  %vm3861_vm3 = vmmov 0   ;;  %vm1247_vm4 = vcmask 261120   ;;  %v3725_v29 = vld [vmem:[%s4039_s4 + $0x10] sm:$0xff]   ;;  %s4504_s18 = scalar_lea.vmem %s4465_s14, %s4017_s0 }
 0x27f   : > { %3425 = vmatprep.subr.bf16.mxu0 %v3860_v26  ;;  %3449 = vmatprep.subr.bf16.mxu1 %v3860_v26  ;;  %v3726_v31 = vld [vmem:[%s4039_s4 + $0x18] sm:$0xff]   ;;  %v3237_v36 = vld [vmem:[%s4044_s17] ss:$0 sm:$0xff]  ;;  %v3241_v37 = vld [vmem:[%s4044_s17 + $0x1] ss:$0 sm:$0xff]  ;;  %vm1417_vm5 = vcmask 64512  }
 0x280   : > { %3426 = vmatpush3.bf16.msra.mxu0 %v3723_v25  ;;  %3429 = vmatprep.mubr.msk.bf16.mxu0 %vm3861_vm3, %v3860_v26  ;;  %s3862_s28 = smov 112   ;;  %s3863_s3 = smov 120   ;;  %v3727_v47 = vld [vmem:[%s4039_s4 + $0x20] sm:$0xff]   ;;  %v3728_v48 = vld [vmem:[%s4039_s4 + $0x28] sm:$0xff]   ;;  %vm1479_vm6 = vcmask 1043456   ;;  %vm1641_vm7 = vcmask 130112  }
 0x281   : > { %3427 = vmatprep.subr.bf16.mxu0 %v3860_v26  ;;  %3451 = vmatprep.mubr.msk.bf16.mxu1 %vm3861_vm3, %v3860_v26  ;;  %s3864_s27 = smov 104   ;;  %v3245_v62 = vld [vmem:[%s4044_s17 + $0x2] ss:$0 sm:$0xff]  ;;  %s3865_s25 = smov 8   ;;  %vm1757_vm8 = vcmask 195712   ;;  %vm1873_vm9 = vcmask 261312  }
 0x282   : > { %s3866_s22 = smov 16   ;;  %s3867_s9 = smov 24  }
 0x283   : > { %s4501_s30 = sld [smem:[#allocation16_spill]]  ;;  %p3305_p5 = scmp.ne.s32.totalorder %s3833_s21, 1 }
 0x284   : > { %v4171_v28 = vld [vmem:[#allocation2] sm:$0xff]  ;;  %3428 = vmatpush3.bf16.msra.mxu0 %v3724_v27  ;;  %vm3869_vm11 = vmmov (!%p3305_p5), 0  }
 0x285   : > { %v1222_v30 = vpack.c.bf16 %v4171_v28, %v4171_v28  ;;  %3433 = vmatprep.subr.bf16.mxu0 %v3860_v26 }
 0x287   : > { %3430 = vmatmul.mubr.msk.bf16.vlgmr.msra.gmra.mrb[0].mxu0 %vm1247_vm4, %v1222_v30 }
 0x288   : > { %3434 = vmatpush3.bf16.msra.mxu0 %v3725_v29  ;;  %3437 = vmatprep.mubr.msk.bf16.mxu0 %vm3861_vm3, %v3860_v26 }
 0x289   : > { %3435 = vmatprep.subr.bf16.mxu0 %v3860_v26  ;;  %s4502_s8 = scalar_lea.vmem %s4501_s30, %s4014_s26 }
 0x28c   : > { %3436 = vmatpush3.bf16.msra.mxu0 %v3726_v31 }
 0x28d   : > { %3441 = vmatprep.subr.bf16.mxu0 %v3860_v26 }
 0x28f   : > { %3438 = vmatmul.mubr.msk.bf16.vlgmr.msra.gmra.mrb[4].mxu0 %vm1247_vm4, %v1222_v30 }
 0x290   : > { %3445 = vmatprep.mubr.msk.bf16.mxu0 %vm3861_vm3, %v3860_v26  ;;  %3442 = vmatpush3.bf16.msra.mxu0 %v3727_v47 }
 0x291   : > { %3443 = vmatprep.subr.bf16.mxu0 %v3860_v26 }
 0x294   : > { %3444 = vmatpush3.bf16.msra.mxu0 %v3728_v48 }
 0x295   : > { %3455 = vmatprep.subr.bf16.mxu0 %v3860_v26 }
 0x297   : > { %3446 = vmatmul.mubr.msk.bf16.vlgmr.msra.gmra.mrb[8].mxu0 %vm1247_vm4, %v1222_v30 }
 0x298   : > { %3457 = vmatprep.mubr.msk.bf16.mxu0 %vm3861_vm3, %v3860_v26 }
 0x35a   : > { %v1285_v32 = vpop.f32.mrb[0].mxu0 }
 0x35b   : > { %v3431_v33 = vpop.f32.mrb[1].mxu0  ;;  %v1286_v38 = vadd.f32 %v3237_v36, %v1285_v32 }
 0x35c   : > { %v1288_v34 = vpop.f32.mrb[2].mxu0 }
 0x35d   : > { %v3432_v35 = vpop.f32.mrb[3].mxu0  ;;  %v1291_v43 = vmul.f32 0.35355338, %v1286_v38 }
 0x35f   : > { %v1414_v46 = vpack.c.bf16 %v1291_v43, %v1291_v43 }
 0x362   : > { %v1347_v39 = vpop.f32.mrb[4].mxu0 }
 0x363   : > { %v1348_v40 = vadd.f32 %v3241_v37, %v1347_v39  ;;  %v3439_v41 = vpop.f32.mrb[5].mxu0 }
 0x364   : > { %v1350_v42 = vpop.f32.mrb[6].mxu0 }
 0x365   : > { %v1415_v44 = vpack.c.bf16 %v1348_v40, %v1348_v40  ;;  %v3440_v45 = vpop.f32.mrb[7].mxu0 }
 0x367   : > { %1645 = vrot.lane.b32.xlu1 %v1415_v44, %s3862_s28  ;;  %1528 = vrot.lane.b32.xlu0 %v1415_v44, %s3863_s3  ;;  %v1422_v19 = vsel %vm1417_vm5, %v1415_v44, 0 }
 0x368   : > { %3450 = vmatpush3.bf16.xpose.msra.mxu1 %v1422_v19 }
 0x369   : > { %3461 = vmatprep.subr.bf16.mxu1 %v3860_v26 }
 0x36a   : > { %v1408_v63 = vpop.f32.mrb[8].mxu0 }
 0x36b   : > { %1643 = vrot.lane.b32.xlu1 %v1414_v46, %s3862_s28  ;;  %1525 = vrot.lane.b32.xlu0 %v1414_v46, %s3863_s3  ;;  %v1409_v0 = vadd.f32 %v3245_v62, %v1408_v63  ;;  %v3447_v1 = vpop.f32.mrb[9].mxu0 }
 0x36c   : > { %v1411_v2 = vpop.f32.mrb[10].mxu0 }
 0x36d   : > { %v1416_v3 = vpack.c.bf16 %v1409_v0, %v1409_v0  ;;  %v3448_v4 = vpop.f32.mrb[11].mxu0 }
 0x36f   : > { %1759 = vrot.lane.b32.xlu1 %v1414_v46, %s3864_s27  ;;  %1761 = vrot.lane.b32.xlu0 %v1415_v44, %s3864_s27  ;;  %v1481_v5 = vsel %vm1479_vm6, %v1416_v3, 0 }
 0x370   : > { %3452 = vmatmul.mubr.msk.bf16.vlgmr.msra.gmra.mrb[0].mxu1 %vm1417_vm5, %v1414_v46  ;;  %3456 = vmatpush3.bf16.msra.mxu0 %v1481_v5 }
 0x371   : > { %3463 = vmatprep.mubr.msk.bf16.mxu1 %vm3861_vm3, %v3860_v26  ;;  %3467 = vmatprep.subr.bf16.mxu0 %v3860_v26 }
 0x3d9   : > { %v1529_v49 = vpop.permute.xlu0 %1528  ;;  %v1646_v51 = vpop.permute.xlu1 %1645 }
 0x3da   : > { %v1534_v50 = vsel %vm1417_vm5, %v1529_v49, 0  ;;  %v1651_v53 = vsel %vm1417_vm5, %v1646_v51, 0 }
 0x3db   : > { %3462 = vmatpush3.bf16.xpose.msra.mxu1 %v1534_v50 }
 0x3dc   : > { %3473 = vmatprep.subr.bf16.mxu1 %v3860_v26 }
 0x3dd   : > { %v1526_v52 = vpop.permute.xlu0 %1525  ;;  %v1644_v55 = vpop.permute.xlu1 %1643 }
 0x3e1   : > { %v1762_v54 = vpop.permute.xlu0 %1761  ;;  %v1760_v57 = vpop.permute.xlu1 %1759 }
 0x3e2   : > { %3464 = vmatmul.mubr.msk.bf16.vlgmr.msra.gmra.mrb[4].mxu1 %vm1417_vm5, %v1526_v52  ;;  %v1767_v56 = vsel %vm1417_vm5, %v1762_v54, 0 }
 0x3e3   : > { %3474 = vmatpush3.bf16.xpose.msra.mxu1 %v1651_v53  ;;  %3475 = vmatprep.mubr.msk.bf16.mxu1 %vm3861_vm3, %v3860_v26 }
 0x3e4   : > { %3485 = vmatprep.subr.bf16.mxu1 %v3860_v26 }
 0x3ea   : > { %3476 = vmatmul.mubr.msk.bf16.vlgmr.msra.gmra.mrb[8].mxu1 %vm1417_vm5, %v1644_v55 }
 0x3eb   : > { %3486 = vmatpush3.bf16.xpose.msra.mxu1 %v1767_v56  ;;  %3487 = vmatprep.mubr.msk.bf16.mxu1 %vm3861_vm3, %v3860_v26 }
 0x3ec   : > { %3497 = vmatprep.subr.bf16.mxu1 %v3860_v26 }
 0x3f2   : > { %3488 = vmatmul.mubr.msk.bf16.vlgmr.msra.gmra.mrb[12].mxu1 %vm1417_vm5, %v1760_v57 }
 0x3f3   : > { %3501 = vmatprep.mubr.msk.bf16.mxu1 %vm3861_vm3, %v3860_v26 }
 0x443   : > { %v1458_v14 = vpop.f32.mrb[0].mxu1 }
 0x444   : > { %v3453_v58 = vpop.f32.mrb[1].mxu1  ;;  %v1464_v59 = vsel %vm1417_vm5, %v1458_v14, -inf }
 0x445   : > { %1465 = vmax.xlane.f32.xlu0 %v1464_v59  ;;  %v1461_v60 = vpop.f32.mrb[2].mxu1 }
 0x446   : > { %v3454_v61 = vpop.f32.mrb[3].mxu1 }
 0x4b5   : > { %v1570_v6 = vpop.f32.mrb[4].mxu1 }
 0x4b6   : > { %v3465_v7 = vpop.f32.mrb[5].mxu1  ;;  %v1576_v8 = vsel %vm1417_vm5, %v1570_v6, -inf }
 0x4b7   : > { %1577 = vmax.xlane.f32.xlu1 %v1576_v8  ;;  %v1573_v9 = vpop.f32.mrb[6].mxu1 }
 0x4b8   : > { %v3466_v10 = vpop.f32.mrb[7].mxu1  ;;  %v3729_v9 = vld [vmem:[%s4039_s4 + $0x30] sm:$0xff]  }
 0x4b9   : > { %3498 = vmatpush3.bf16.msra.mxu1 %v3729_v9  ;;  %v3730_v10 = vld [vmem:[%s4039_s4 + $0x38] sm:$0xff]   ;;  %v3736_v9 = vld [vmem:[%s4039_s4 + $0x68] sm:$0xff]  }
 0x4ba   : > { %3499 = vmatprep.subr.bf16.mxu1 %v3860_v26 }
 0x4bd   : > { %v1687_v11 = vpop.f32.mrb[8].mxu1  ;;  %3500 = vmatpush3.bf16.msra.mxu1 %v3730_v10 }
 0x4be   : > { %v3477_v12 = vpop.f32.mrb[9].mxu1  ;;  %v1693_v13 = vsel %vm1417_vm5, %v1687_v11, -inf  ;;  %3513 = vmatprep.subr.bf16.mxu1 %v3860_v26 }
 0x4bf   : > { %1694 = vmax.xlane.f32.xlu0 %v1693_v13  ;;  %v1690_v15 = vpop.f32.mrb[10].mxu1 }
 0x4c0   : > { %v3478_v16 = vpop.f32.mrb[11].mxu1 }
 0x4c5   : > { %v1803_v17 = vpop.f32.mrb[12].mxu1 }
 0x4c6   : > { %v3489_v18 = vpop.f32.mrb[13].mxu1  ;;  %v1809_v20 = vsel %vm1417_vm5, %v1803_v17, -inf }
 0x4c7   : > { %1810 = vmax.xlane.f32.xlu0 %v1809_v20  ;;  %v1806_v21 = vpop.f32.mrb[14].mxu1 }
 0x4c8   : > { %v3490_v22 = vpop.f32.mrb[15].mxu1 }
 0x4d2   : > { %v1466_v23 = vpop.xlane.xlu0 %1465 }
 0x4d3   : > { %v1467_v24 = vsub.f32 %v1458_v14, %v1466_v23 }
 0x4d5   : > { %v1468_v25 = vmul.f32 1.442695, %v1467_v24 }
 0x4d7   : > { %3749 = vpow2.f32 %v1468_v25 }
 0x4e1   : > { %v3750_v27 = vpop.eup %3749 }
 0x4e2   : > { %v1470_v29 = vsel %vm1417_vm5, %v3750_v27, 0.0 }
 0x4e3   : > { %1471 = vadd.xlane.f32.xlu1 %v1470_v29 }
 0x4f4   : > { %1589 = vrot.lane.b32.xlu1 %v1416_v3, %s3863_s3 }
 0x544   : > { %v1578_v30 = vpop.xlane.xlu1 %1577 }
 0x545   : > { %v1579_v31 = vsub.f32 %v1570_v6, %v1578_v30 }
 0x547   : > { %v1580_v32 = vmul.f32 1.442695, %v1579_v31 }
 0x549   : > { %3751 = vpow2.f32 %v1580_v32 }
 0x54c   : > { %v1695_v33 = vpop.xlane.xlu0 %1694 }
 0x54d   : > { %v1696_v34 = vsub.f32 %v1687_v11, %v1695_v33 }
 0x54f   : > { %v1697_v35 = vmul.f32 1.442695, %v1696_v34 }
 0x551   : > { %3753 = vpow2.f32 %v1697_v35 }
 0x553   : > { %v3752_v36 = vpop.eup %3751 }
 0x554   : > { %v1811_v37 = vpop.xlane.xlu0 %1810  ;;  %v1582_v38 = vsel %vm1417_vm5, %v3752_v36, 0.0 }
 0x555   : > { %v1812_v39 = vsub.f32 %v1803_v17, %v1811_v37  ;;  %1583 = vadd.xlane.f32.xlu0 %v1582_v38 }
 0x557   : > { %v1813_v40 = vmul.f32 1.442695, %v1812_v39 }
 0x559   : > { %3755 = vpow2.f32 %v1813_v40 }
 0x55b   : > { %v3754_v41 = vpop.eup %3753 }
 0x55c   : > { %v1699_v42 = vsel %vm1417_vm5, %v3754_v41, 0.0 }
 0x55d   : > { %1700 = vadd.xlane.f32.xlu1 %v1699_v42  ;;  %v3732_v42 = vld [vmem:[%s4039_s4 + $0x58] sm:$0xff]  }
 0x563   : > { %v3756_v43 = vpop.eup %3755 }
 0x564   : > { %v1815_v44 = vsel %vm1417_vm5, %v3756_v43, 0.0 }
 0x565   : > { %1816 = vadd.xlane.f32.xlu0 %v1815_v44  ;;  %v3733_v44 = vld [vmem:[%s4039_s4 + $0x40] sm:$0xff]  }
 0x56e   : > { %1821 = vrot.lane.b32.xlu1 %v1416_v3, %s3864_s27 }
 0x570   : > { %v1472_v45 = vpop.xlane.xlu1 %1471 }
 0x571   : > { %3757 = vrcp.f32 %v1472_v45  ;;  %v3734_v45 = vld [vmem:[%s4039_s4 + $0x48] sm:$0xff]  }
 0x574   : > { %v1590_v46 = vpop.permute.xlu1 %1589 }
 0x575   : > { %v1595_v49 = vsel %vm1479_vm6, %v1590_v46, 0 }
 0x57b   : > { %v3758_v19 = vpop.eup %3757  ;;  %1705 = vrot.lane.b32.xlu0 %v1416_v3, %s3862_s28 }
 0x57c   : > { %v1474_v47 = vmul.f32 %v3758_v19, %v3750_v27  ;;  %v3257_v27 = vld [vmem:[%s4044_s17 + $0x3] ss:$0 sm:$0xff] }
 0x57e   : > { %v1475_v48 = vpack.c.bf16 %v1474_v47, %v1474_v47 }
 0x580   : > { %3458 = vmatmul.mubr.msk.bf16.vlgmr.msra.gmra.mrb[12].mxu0 %vm1417_vm5, %v1475_v48 }
 0x581   : > { %3468 = vmatpush3.bf16.msra.mxu0 %v1595_v49  ;;  %3469 = vmatprep.mubr.msk.bf16.mxu0 %vm3861_vm3, %v3860_v26  ;;  %v3261_v49 = vld [vmem:[%s4069_s1] ss:$0 sm:$0xff] }
 0x582   : > { %3479 = vmatprep.subr.bf16.mxu0 %v3860_v26 }
 0x5e2   : > { %v1584_v50 = vpop.xlane.xlu0 %1583 }
 0x5e3   : > { %3759 = vrcp.f32 %v1584_v50 }
 0x5ea   : > { %v1701_v51 = vpop.xlane.xlu1 %1700 }
 0x5eb   : > { %3761 = vrcp.f32 %v1701_v51  ;;  %v3262_v51 = vld [vmem:[%s4069_s1 + $0x1] ss:$0 sm:$0xff] }
 0x5ed   : > { %v3760_v52 = vpop.eup %3759 }
 0x5ee   : > { %v1586_v53 = vmul.f32 %v3760_v52, %v3752_v36  ;;  %v1822_v59 = vpop.permute.xlu1 %1821 }
 0x5ef   : > { %v1827_v61 = vsel %vm1479_vm6, %v1822_v59, 0 }
 0x5f0   : > { %v1587_v54 = vpack.c.bf16 %v1586_v53, %v1586_v53 }
 0x5f2   : > { %v1817_v55 = vpop.xlane.xlu0 %1816  ;;  %3470 = vmatmul.mubr.msk.bf16.vlgmr.msra.gmra.mrb[16].mxu0 %vm1417_vm5, %v1587_v54 }
 0x5f3   : > { %3763 = vrcp.f32 %v1817_v55  ;;  %3481 = vmatprep.mubr.msk.bf16.mxu0 %vm3861_vm3, %v3860_v26  ;;  %v3267_v55 = vld [vmem:[%s4044_s17 + $0x5] ss:$0 sm:$0xff] }
 0x5f5   : > { %v3762_v56 = vpop.eup %3761 }
 0x5f6   : > { %v1703_v57 = vmul.f32 %v3762_v56, %v3754_v41  ;;  %v1706_v14 = vpop.permute.xlu0 %1705  ;;  %v3731_v41 = vld [vmem:[%s4039_s4 + $0x50] sm:$0xff]  }
 0x5f7   : > { %v1711_v58 = vsel %vm1479_vm6, %v1706_v14, 0 }
 0x5f8   : > { %3480 = vmatpush3.bf16.msra.mxu0 %v1711_v58  ;;  %v1704_v60 = vpack.c.bf16 %v1703_v57, %v1703_v57 }
 0x5f9   : > { %3491 = vmatprep.subr.bf16.mxu0 %v3860_v26 }
 0x5fb   : > { %3482 = vmatmul.mubr.msk.bf16.vlgmr.msra.gmra.mrb[20].mxu0 %vm1417_vm5, %v1704_v60 }
 0x5fc   : > { %3492 = vmatpush3.bf16.msra.mxu0 %v1827_v61  ;;  %3493 = vmatprep.mubr.msk.bf16.mxu0 %vm3861_vm3, %v3860_v26 }
 0x5fd   : > { %v3764_v62 = vpop.eup %3763  ;;  %3505 = vmatprep.subr.bf16.mxu0 %v3860_v26 }
 0x5fe   : > { %v1819_v63 = vmul.f32 %v3764_v62, %v3756_v43  ;;  %v1223_v43 = vld [vmem:[%s4032_s23] sm:$0xff] }
 0x5ff   : > { %v3263_v62 = vld [vmem:[%s4044_s17 + $0x4] ss:$0 sm:$0xff] }
 0x600   : > { %v1820_v0 = vpack.c.bf16 %v1819_v63, %v1819_v63 }
 0x603   : > { %3494 = vmatmul.mubr.msk.bf16.vlgmr.msra.gmra.mrb[24].mxu0 %vm1417_vm5, %v1820_v0 }
 0x604   : > { %3509 = vmatprep.mubr.msk.bf16.mxu0 %vm3861_vm3, %v3860_v26  ;;  %3506 = vmatpush3.bf16.msra.mxu0 %v3733_v44 }
 0x605   : > { %3507 = vmatprep.subr.bf16.mxu0 %v3860_v26 }
 0x608   : > { %3508 = vmatpush3.bf16.msra.mxu0 %v3734_v45 }
 0x609   : > { %3521 = vmatprep.subr.bf16.mxu0 %v3860_v26 }
 0x653   : > { %v1517_v1 = vpop.f32.mrb[12].mxu0 }
 0x654   : > { %1523 = vst.msk [vmem:[#allocation3] sm:$0xff] %vm1417_vm5, %v1517_v1  ;;  %v3459_v2 = vpop.f32.mrb[13].mxu0 }
 0x655   : > { %v1520_v3 = vpop.f32.mrb[14].mxu0 }
 0x656   : > { %v3460_v4 = vpop.f32.mrb[15].mxu0 }
 0x6c5   : > { %v1631_v5 = vpop.f32.mrb[16].mxu0 }
 0x6c6   : > { %1638 = vrot.lane.b32.xlu1 %v1631_v5, %s3865_s25  ;;  %v3471_v6 = vpop.f32.mrb[17].mxu0 }
 0x6c7   : > { %v1634_v7 = vpop.f32.mrb[18].mxu0 }
 0x6c8   : > { %v3472_v8 = vpop.f32.mrb[19].mxu0 }
 0x6c9   : > { %v3735_v8 = vld [vmem:[%s4039_s4 + $0x60] sm:$0xff]  }
 0x6ce   : > { %v1747_v11 = vpop.f32.mrb[20].mxu0 }
 0x6cf   : > { %1754 = vrot.lane.b32.xlu0 %v1747_v11, %s3866_s22  ;;  %v3483_v12 = vpop.f32.mrb[21].mxu0 }
 0x6d0   : > { %v1750_v13 = vpop.f32.mrb[22].mxu0 }
 0x6d1   : > { %v3484_v15 = vpop.f32.mrb[23].mxu0 }
 0x6d6   : > { %v1863_v16 = vpop.f32.mrb[24].mxu0 }
 0x6d7   : > { %1870 = vrot.lane.b32.xlu1 %v1863_v16, %s3867_s9  ;;  %v3495_v17 = vpop.f32.mrb[25].mxu0 }
 0x6d8   : > { %v1866_v18 = vpop.f32.mrb[26].mxu0 }
 0x6d9   : > { %v3496_v20 = vpop.f32.mrb[27].mxu0  ;;  %v3275_v18 = vld [vmem:[%s4502_s8] ss:$0 sm:$0xff] }
 0x738   : > { %v1639_v21 = vpop.permute.xlu1 %1638 }
 0x739   : > { %1642 = vst.msk [vmem:[#allocation3] sm:$0xff] %vm1641_vm7, %v1639_v21 }
 0x741   : > { %v1755_v22 = vpop.permute.xlu0 %1754 }
 0x742   : > { %1758 = vst.msk [vmem:[#allocation3] sm:$0xff] %vm1757_vm8, %v1755_v22 }
 0x749   : > { %v1871_v23 = vpop.permute.xlu1 %1870 }
 0x74a   : > { %1874 = vst.msk [vmem:[#allocation3] sm:$0xff] %vm1873_vm9, %v1871_v23 }
 0x751   : > { %v1875_v24 = vld [vmem:[#allocation3] sm:$0xff] }
 0x752   : > { %v1876_v25 = vpack.c.bf16 %v1875_v24, %v1875_v24 }
 0x754   : > { %3502 = vmatmul.mubr.msk.bf16.vlgmr.msra.gmra.mrb[16].mxu1 %vm1247_vm4, %v1876_v25 }
 0x755   : > { %3517 = vmatprep.mubr.msk.bf16.mxu1 %vm3861_vm3, %v3860_v26  ;;  %3514 = vmatpush3.bf16.msra.mxu1 %v3731_v41 }
 0x756   : > { %3515 = vmatprep.subr.bf16.mxu1 %v3860_v26 }
 0x759   : > { %3516 = vmatpush3.bf16.msra.mxu1 %v3732_v42 }
 0x75a   : > { %3529 = vmatprep.subr.bf16.mxu1 %v3860_v26 }
 0x827   : > { %v1935_v29 = vpop.f32.mrb[16].mxu1 }
 0x828   : > { %v1936_v30 = vadd.f32 %v3257_v27, %v1935_v29  ;;  %v3503_v31 = vpop.f32.mrb[17].mxu1  ;;  %v3271_v27 = vld [vmem:[%s4044_s17 + $0x6] ss:$0 sm:$0xff] }
 0x829   : > { %v1938_v32 = vpop.f32.mrb[18].mxu1 }
 0x82a   : > { %v3504_v33 = vpop.f32.mrb[19].mxu1  ;;  %v1941_v34 = vadd.f32 %v1936_v30, %v4171_v28  ;;  %v1224_v28 = vpack.c.bf16 %v1223_v43, %v1223_v43 }
 0x82c   : > { %v1944_v35 = vsel %vm1247_vm4, %v1941_v34, 0.0  ;;  %3518 = vmatmul.mubr.msk.bf16.vlgmr.msra.gmra.mrb[20].mxu1 %vm1247_vm4, %v1224_v28 }
 0x82d   : > { %1945 = vadd.xlane.f32.xlu0 %v1944_v35  ;;  %3531 = vmatprep.mubr.msk.bf16.mxu1 %vm3861_vm3, %v3860_v26 }
 0x8ba   : > { %v1946_v36 = vpop.xlane.xlu0 %1945 }
 0x8bb   : > { %v1947_v37 = vmul.f32 0.03125, %v1946_v36 }
 0x8bd   : > { %v1948_v38 = vsub.f32 %v1941_v34, %v1947_v37 }
 0x8bf   : > { %v1949_v39 = vmul.f32 %v1948_v38, %v1948_v38 }
 0x8c1   : > { %v1950_v40 = vsel %vm1247_vm4, %v1949_v39, 0.0 }
 0x8c2   : > { %1951 = vadd.xlane.f32.xlu1 %v1950_v40 }
 0x8ff   : > { %v2091_v56 = vpop.f32.mrb[20].mxu1 }
 0x900   : > { %v2092_v57 = vadd.f32 %v3267_v55, %v2091_v56  ;;  %v3519_v14 = vpop.f32.mrb[21].mxu1 }
 0x901   : > { %v2094_v58 = vpop.f32.mrb[22].mxu1 }
 0x902   : > { %v2159_v59 = vpack.c.bf16 %v2092_v57, %v2092_v57  ;;  %v3520_v60 = vpop.f32.mrb[23].mxu1 }
 0x904   : > { %2276 = vrot.lane.b32.xlu0 %v2159_v59, %s3863_s3  ;;  %v2171_v61 = vsel %vm1417_vm5, %v2159_v59, 0 }
 0x905   : > { %3530 = vmatpush3.bf16.xpose.msra.mxu1 %v2171_v61 }
 0x906   : > { %3541 = vmatprep.subr.bf16.mxu1 %v3860_v26 }
 0x908   : > { %2392 = vrot.lane.b32.xlu0 %v2159_v59, %s3862_s28 }
 0x90c   : > { %2507 = vrot.lane.b32.xlu0 %v2159_v59, %s3864_s27 }
 0x94f   : > { %v1952_v19 = vpop.xlane.xlu1 %1951 }
 0x950   : > { %v1953_v46 = vmul.f32 0.03125, %v1952_v19 }
 0x952   : > { %v1954_v47 = vadd.f32 1e-05, %v1953_v46 }
 0x954   : > { %3765 = vrsqrt.f32 %v1954_v47 }
 0x95e   : > { %v3766_v48 = vpop.eup %3765 }
 0x95f   : > { %v1956_v50 = vmul.f32 %v3766_v48, %v1948_v38 }
 0x961   : > { %v1961_v52 = vmul.f32 %v3261_v49, %v1956_v50 }
 0x963   : > { %v4288_v53 = vadd.f32 %v3262_v51, %v1961_v52 }
 0x965   : > { %v1967_v54 = vpack.c.bf16 %v4288_v53, %v4288_v53 }
 0x967   : > { %3510 = vmatmul.mubr.msk.bf16.vlgmr.msra.gmra.mrb[28].mxu0 %vm1247_vm4, %v1967_v54 }
 0x968   : > { %3525 = vmatprep.mubr.msk.bf16.mxu0 %vm3861_vm3, %v3860_v26  ;;  %3522 = vmatpush3.bf16.msra.mxu0 %v3735_v8 }
 0x969   : > { %3523 = vmatprep.subr.bf16.mxu0 %v3860_v26 }
 0x96c   : > { %3524 = vmatpush3.bf16.msra.mxu0 %v3736_v9 }
 0x96d   : > { %3535 = vmatprep.subr.bf16.mxu0 %v3860_v26 }
 0x96f   : > { %3526 = vmatmul.mubr.msk.bf16.vlgmr.msra.gmra.mrb[32].mxu0 %vm1247_vm4, %v1224_v28 }
 0x970   : > { %3537 = vmatprep.mubr.msk.bf16.mxu0 %vm3861_vm3, %v3860_v26 }
 0x976   : > { %v2277_v5 = vpop.permute.xlu0 %2276 }
 0x977   : > { %v2282_v7 = vsel %vm1417_vm5, %v2277_v5, 0 }
 0x97a   : > { %v2393_v10 = vpop.permute.xlu0 %2392 }
 0x97b   : > { %v2398_v12 = vsel %vm1417_vm5, %v2393_v10, 0 }
 0x97e   : > { %v2508_v13 = vpop.permute.xlu0 %2507 }
 0x97f   : > { %v2513_v16 = vsel %vm1417_vm5, %v2508_v13, 0 }
 0xa3a   : > { %v2026_v63 = vpop.f32.mrb[28].mxu0 }
 0xa3b   : > { %v2027_v0 = vadd.f32 %v3263_v62, %v2026_v63  ;;  %v3511_v1 = vpop.f32.mrb[29].mxu0 }
 0xa3c   : > { %v2029_v2 = vpop.f32.mrb[30].mxu0 }
 0xa3d   : > { %v2032_v3 = vmul.f32 0.35355338, %v2027_v0  ;;  %v3512_v4 = vpop.f32.mrb[31].mxu0 }
 0xa3f   : > { %v2158_v6 = vpack.c.bf16 %v2032_v3, %v2032_v3 }
 0xa41   : > { %2273 = vrot.lane.b32.xlu1 %v2158_v6, %s3863_s3  ;;  %3532 = vmatmul.mubr.msk.bf16.vlgmr.msra.gmra.mrb[24].mxu1 %vm1417_vm5, %v2158_v6 }
 0xa42   : > { %3542 = vmatpush3.bf16.xpose.msra.mxu1 %v2282_v7  ;;  %3543 = vmatprep.mubr.msk.bf16.mxu1 %vm3861_vm3, %v3860_v26  ;;  %v2152_v29 = vpop.f32.mrb[32].mxu0 }
 0xa43   : > { %3553 = vmatprep.subr.bf16.mxu1 %v3860_v26  ;;  %v2153_v30 = vadd.f32 %v3271_v27, %v2152_v29  ;;  %v3527_v31 = vpop.f32.mrb[33].mxu0 }
 0xa44   : > { %v2155_v32 = vpop.f32.mrb[34].mxu0 }
 0xa45   : > { %2390 = vrot.lane.b32.xlu1 %v2158_v6, %s3862_s28  ;;  %v2160_v33 = vpack.c.bf16 %v2153_v30, %v2153_v30  ;;  %v3528_v34 = vpop.f32.mrb[35].mxu0 }
 0xa47   : > { %v2229_v35 = vsel %vm1479_vm6, %v2160_v33, 0 }
 0xa48   : > { %3536 = vmatpush3.bf16.msra.mxu0 %v2229_v35 }
 0xa49   : > { %2505 = vrot.lane.b32.xlu1 %v2158_v6, %s3864_s27  ;;  %3547 = vmatprep.subr.bf16.mxu0 %v3860_v26 }
 0xab3   : > { %v2274_v11 = vpop.permute.xlu1 %2273 }
 0xab4   : > { %3544 = vmatmul.mubr.msk.bf16.vlgmr.msra.gmra.mrb[28].mxu1 %vm1417_vm5, %v2274_v11 }
 0xab5   : > { %3554 = vmatpush3.bf16.xpose.msra.mxu1 %v2398_v12  ;;  %3555 = vmatprep.mubr.msk.bf16.mxu1 %vm3861_vm3, %v3860_v26 }
 0xab6   : > { %3565 = vmatprep.subr.bf16.mxu1 %v3860_v26 }
 0xab7   : > { %v2391_v15 = vpop.permute.xlu1 %2390 }
 0xabb   : > { %v2506_v17 = vpop.permute.xlu1 %2505 }
 0xabc   : > { %3556 = vmatmul.mubr.msk.bf16.vlgmr.msra.gmra.mrb[32].mxu1 %vm1417_vm5, %v2391_v15 }
 0xabd   : > { %3566 = vmatpush3.bf16.xpose.msra.mxu1 %v2513_v16  ;;  %3567 = vmatprep.mubr.msk.bf16.mxu1 %vm3861_vm3, %v3860_v26 }
 0xabe   : > { %3577 = vmatprep.subr.bf16.mxu1 %v3860_v26 }
 0xac4   : > { %3568 = vmatmul.mubr.msk.bf16.vlgmr.msra.gmra.mrb[36].mxu1 %vm1417_vm5, %v2506_v17 }
 0xac5   : > { %3581 = vmatprep.mubr.msk.bf16.mxu1 %vm3861_vm3, %v3860_v26 }
 0xb14   : > { %v2207_v20 = vpop.f32.mrb[24].mxu1 }
 0xb15   : > { %v2208_v21 = vadd.f32 %v3275_v18, %v2207_v20  ;;  %v3533_v22 = vpop.f32.mrb[25].mxu1 }
 0xb16   : > { %v2210_v23 = vpop.f32.mrb[26].mxu1 }
 0xb17   : > { %v3534_v24 = vpop.f32.mrb[27].mxu1  ;;  %v2213_v25 = vsel %vm1417_vm5, %v2208_v21, -inf }
 0xb18   : > { %2214 = vmax.xlane.f32.xlu0 %v2213_v25 }
 0xb87   : > { %v2318_v36 = vpop.f32.mrb[28].mxu1 }
 0xb88   : > { %v2319_v37 = vadd.f32 %v3275_v18, %v2318_v36  ;;  %v3545_v38 = vpop.f32.mrb[29].mxu1 }
 0xb89   : > { %v2321_v39 = vpop.f32.mrb[30].mxu1 }
 0xb8a   : > { %v3546_v40 = vpop.f32.mrb[31].mxu1  ;;  %v2324_v41 = vsel %vm1417_vm5, %v2319_v37, -inf }
 0xb8b   : > { %2325 = vmax.xlane.f32.xlu1 %v2324_v41 }
 0xb8f   : > { %v2434_v42 = vpop.f32.mrb[32].mxu1 }
 0xb90   : > { %v2435_v43 = vadd.f32 %v3275_v18, %v2434_v42  ;;  %v3557_v28 = vpop.f32.mrb[33].mxu1  ;;  %v3737_v42 = vld [vmem:[%s4039_s4 + $0x70] sm:$0xff]  }
 0xb91   : > { %v2437_v44 = vpop.f32.mrb[34].mxu1  ;;  %3578 = vmatpush3.bf16.msra.mxu1 %v3737_v42 }
 0xb92   : > { %v3558_v45 = vpop.f32.mrb[35].mxu1  ;;  %v2440_v19 = vsel %vm1417_vm5, %v2435_v43, -inf  ;;  %3579 = vmatprep.subr.bf16.mxu1 %v3860_v26 }
 0xb93   : > { %2441 = vmax.xlane.f32.xlu0 %v2440_v19 }
 0xb97   : > { %v2549_v46 = vpop.f32.mrb[36].mxu1 }
 0xb98   : > { %v2550_v47 = vadd.f32 %v3275_v18, %v2549_v46  ;;  %v3569_v48 = vpop.f32.mrb[37].mxu1 }
 0xb99   : > { %v2552_v49 = vpop.f32.mrb[38].mxu1 }
 0xb9a   : > { %v3570_v50 = vpop.f32.mrb[39].mxu1  ;;  %v2555_v51 = vsel %vm1417_vm5, %v2550_v47, -inf }
 0xb9b   : > { %2556 = vmax.xlane.f32.xlu0 %v2555_v51 }
 0xba5   : > { %v2215_v52 = vpop.xlane.xlu0 %2214 }
 0xba6   : > { %v2216_v54 = vsub.f32 %v2208_v21, %v2215_v52 }
 0xba8   : > { %v2217_v55 = vmul.f32 1.442695, %v2216_v54 }
 0xbaa   : > { %3767 = vpow2.f32 %v2217_v55 }
 0xbb4   : > { %v3768_v56 = vpop.eup %3767 }
 0xbb5   : > { %v2219_v57 = vsel %vm1417_vm5, %v3768_v56, 0.0 }
 0xbb6   : > { %2220 = vadd.xlane.f32.xlu1 %v2219_v57 }
 0xbc7   : > { %2337 = vrot.lane.b32.xlu1 %v2160_v33, %s3863_s3 }
 0xc18   : > { %v2326_v14 = vpop.xlane.xlu1 %2325 }
 0xc19   : > { %v2327_v58 = vsub.f32 %v2319_v37, %v2326_v14 }
 0xc1b   : > { %v2328_v59 = vmul.f32 1.442695, %v2327_v58 }
 0xc1d   : > { %3769 = vpow2.f32 %v2328_v59 }
 0xc20   : > { %v2442_v60 = vpop.xlane.xlu0 %2441 }
 0xc21   : > { %v2443_v61 = vsub.f32 %v2435_v43, %v2442_v60  ;;  %v3738_v43 = vld [vmem:[%s4039_s4 + $0x78] sm:$0xff]  }
 0xc22   : > { %3580 = vmatpush3.bf16.msra.mxu1 %v3738_v43 }
 0xc23   : > { %v2444_v62 = vmul.f32 1.442695, %v2443_v61  ;;  %3593 = vmatprep.subr.bf16.mxu1 %v3860_v26 }
 0xc25   : > { %3771 = vpow2.f32 %v2444_v62 }
 0xc27   : > { %v3770_v63 = vpop.eup %3769 }
 0xc28   : > { %v2557_v0 = vpop.xlane.xlu0 %2556  ;;  %v2330_v1 = vsel %vm1417_vm5, %v3770_v63, 0.0 }
 0xc29   : > { %v2558_v2 = vsub.f32 %v2550_v47, %v2557_v0  ;;  %2331 = vadd.xlane.f32.xlu0 %v2330_v1 }
 0xc2b   : > { %v2559_v3 = vmul.f32 1.442695, %v2558_v2 }
 0xc2d   : > { %3773 = vpow2.f32 %v2559_v3 }
 0xc2f   : > { %v3772_v4 = vpop.eup %3771 }
 0xc30   : > { %v2446_v5 = vsel %vm1417_vm5, %v3772_v4, 0.0 }
 0xc31   : > { %2447 = vadd.xlane.f32.xlu1 %v2446_v5  ;;  %v3740_v5 = vld [vmem:[%s4054_s29 + $0x8] sm:$0xff]  }
 0xc37   : > { %v3774_v6 = vpop.eup %3773 }
 0xc38   : > { %v2561_v7 = vsel %vm1417_vm5, %v3774_v6, 0.0 }
 0xc39   : > { %2562 = vadd.xlane.f32.xlu0 %v2561_v7 }
 0xc42   : > { %2567 = vrot.lane.b32.xlu1 %v2160_v33, %s3864_s27 }
 0xc43   : > { %v2221_v8 = vpop.xlane.xlu1 %2220 }
 0xc44   : > { %3775 = vrcp.f32 %v2221_v8 }
 0xc47   : > { %v2338_v10 = vpop.permute.xlu1 %2337 }
 0xc48   : > { %v2343_v13 = vsel %vm1479_vm6, %v2338_v10, 0 }
 0xc4e   : > { %v3776_v9 = vpop.eup %3775 }
 0xc4f   : > { %v2223_v11 = vmul.f32 %v3776_v9, %v3768_v56  ;;  %2452 = vrot.lane.b32.xlu0 %v2160_v33, %s3862_s28  ;;  %v3284_v56 = vld [vmem:[%s4044_s17 + $0x7] ss:$0 sm:$0xff]  ;;  %v3288_v9 = vld [vmem:[%s4069_s1 + $0x2] ss:$0 sm:$0xff]  ;;  %s4503_s17 = scalar_lea.vmem %s4463_s12, %s4017_s0 }
 0xc51   : > { %v2224_v12 = vpack.c.bf16 %v2223_v11, %v2223_v11  ;;  %v3289_v11 = vld [vmem:[%s4069_s1 + $0x3] ss:$0 sm:$0xff] }
 0xc53   : > { %3538 = vmatmul.mubr.msk.bf16.vlgmr.msra.gmra.mrb[36].mxu0 %vm1417_vm5, %v2224_v12 }
 0xc54   : > { %3548 = vmatpush3.bf16.msra.mxu0 %v2343_v13  ;;  %3549 = vmatprep.mubr.msk.bf16.mxu0 %vm3861_vm3, %v3860_v26 }
 0xc55   : > { %3559 = vmatprep.subr.bf16.mxu0 %v3860_v26 }
 0xcb6   : > { %v2332_v15 = vpop.xlane.xlu0 %2331 }
 0xcb7   : > { %3777 = vrcp.f32 %v2332_v15 }
 0xcbe   : > { %v2448_v16 = vpop.xlane.xlu1 %2447 }
 0xcbf   : > { %3779 = vrcp.f32 %v2448_v16  ;;  %v3741_v16 = vld [vmem:[%s4060_s7] sm:$0xff]  }
 0xcc1   : > { %v3778_v17 = vpop.eup %3777 }
 0xcc2   : > { %v2334_v18 = vmul.f32 %v3778_v17, %v3770_v63  ;;  %v2568_v27 = vpop.permute.xlu1 %2567  ;;  %v3742_v17 = vld [vmem:[%s4060_s7 + $0x8] sm:$0xff]  }
 0xcc3   : > { %v2573_v30 = vsel %vm1479_vm6, %v2568_v27, 0 }
 0xcc4   : > { %v2335_v20 = vpack.c.bf16 %v2334_v18, %v2334_v18  ;;  %v3743_v18 = vld [vmem:[%s4060_s7 + $0x10] sm:$0xff]  }
 0xcc6   : > { %v2563_v21 = vpop.xlane.xlu0 %2562  ;;  %3550 = vmatmul.mubr.msk.bf16.vlgmr.msra.gmra.mrb[40].mxu0 %vm1417_vm5, %v2335_v20  ;;  %v3744_v20 = vld [vmem:[%s4060_s7 + $0x18] sm:$0xff]  }
 0xcc7   : > { %3781 = vrcp.f32 %v2563_v21  ;;  %3561 = vmatprep.mubr.msk.bf16.mxu0 %vm3861_vm3, %v3860_v26  ;;  %v3745_v21 = vld [vmem:[%s4060_s7 + $0x20] sm:$0xff]  }
 0xcc9   : > { %v3780_v22 = vpop.eup %3779 }
 0xcca   : > { %v2450_v23 = vmul.f32 %v3780_v22, %v3772_v4  ;;  %v2453_v24 = vpop.permute.xlu0 %2452  ;;  %v3739_v4 = vld [vmem:[%s4054_s29] sm:$0xff]   ;;  %v3746_v22 = vld [vmem:[%s4060_s7 + $0x28] sm:$0xff]  }
 0xccb   : > { %v2458_v25 = vsel %vm1479_vm6, %v2453_v24, 0  ;;  %v3748_v24 = vld [vmem:[%s4060_s7 + $0x38] sm:$0xff]  }
 0xccc   : > { %3560 = vmatpush3.bf16.msra.mxu0 %v2458_v25  ;;  %v2451_v29 = vpack.c.bf16 %v2450_v23, %v2450_v23  ;;  %v3747_v23 = vld [vmem:[%s4060_s7 + $0x30] sm:$0xff]   ;;  %v3290_v25 = vld [vmem:[%s4503_s17] ss:$0 sm:$0xff] }
 0xccd   : > { %3571 = vmatprep.subr.bf16.mxu0 %v3860_v26 }
 0xccf   : > { %3562 = vmatmul.mubr.msk.bf16.vlgmr.msra.gmra.mrb[44].mxu0 %vm1417_vm5, %v2451_v29 }
 0xcd0   : > { %3572 = vmatpush3.bf16.msra.mxu0 %v2573_v30  ;;  %3573 = vmatprep.mubr.msk.bf16.mxu0 %vm3861_vm3, %v3860_v26 }
 0xcd1   : > { %v3782_v31 = vpop.eup %3781  ;;  %3585 = vmatprep.subr.bf16.mxu0 %v3860_v26 }
 0xcd2   : > { %v2565_v32 = vmul.f32 %v3782_v31, %v3774_v6 }
 0xcd4   : > { %v2566_v33 = vpack.c.bf16 %v2565_v32, %v2565_v32 }
 0xcd7   : > { %3574 = vmatmul.mubr.msk.bf16.vlgmr.msra.gmra.mrb[48].mxu0 %vm1417_vm5, %v2566_v33 }
 0xcd8   : > { %3589 = vmatprep.mubr.msk.bf16.mxu0 %vm3861_vm3, %v3860_v26  ;;  %3586 = vmatpush3.bf16.msra.mxu0 %v3739_v4 }
 0xcd9   : > { %3587 = vmatprep.subr.bf16.mxu0 %v3860_v26 }
 0xcdc   : > { %3588 = vmatpush3.bf16.msra.mxu0 %v3740_v5 }
 0xd26   : > { %v2265_v34 = vpop.f32.mrb[36].mxu0 }
 0xd27   : > { %2271 = vst.msk [vmem:[#allocation3] sm:$0xff] %vm1417_vm5, %v2265_v34  ;;  %v3539_v35 = vpop.f32.mrb[37].mxu0 }
 0xd28   : > { %v2268_v36 = vpop.f32.mrb[38].mxu0 }
 0xd29   : > { %v3540_v37 = vpop.f32.mrb[39].mxu0 }
 0xd99   : > { %v2379_v38 = vpop.f32.mrb[40].mxu0 }
 0xd9a   : > { %2386 = vrot.lane.b32.xlu1 %v2379_v38, %s3865_s25  ;;  %v3551_v39 = vpop.f32.mrb[41].mxu0 }
 0xd9b   : > { %v2382_v40 = vpop.f32.mrb[42].mxu0 }
 0xd9c   : > { %v3552_v41 = vpop.f32.mrb[43].mxu0 }
 0xda2   : > { %v2494_v28 = vpop.f32.mrb[44].mxu0 }
 0xda3   : > { %2501 = vrot.lane.b32.xlu0 %v2494_v28, %s3866_s22  ;;  %v3563_v44 = vpop.f32.mrb[45].mxu0 }
 0xda4   : > { %v2497_v45 = vpop.f32.mrb[46].mxu0 }
 0xda5   : > { %v3564_v19 = vpop.f32.mrb[47].mxu0 }
 0xdaa   : > { %v2609_v46 = vpop.f32.mrb[48].mxu0 }
 0xdab   : > { %2616 = vrot.lane.b32.xlu1 %v2609_v46, %s3867_s9  ;;  %v3575_v47 = vpop.f32.mrb[49].mxu0 }
 0xdac   : > { %v2612_v48 = vpop.f32.mrb[50].mxu0 }
 0xdad   : > { %v3576_v49 = vpop.f32.mrb[51].mxu0 }
 0xe0c   : > { %v2387_v50 = vpop.permute.xlu1 %2386 }
 0xe0d   : > { %2389 = vst.msk [vmem:[#allocation3] sm:$0xff] %vm1641_vm7, %v2387_v50 }
 0xe15   : > { %v2502_v51 = vpop.permute.xlu0 %2501 }
 0xe16   : > { %2504 = vst.msk [vmem:[#allocation3] sm:$0xff] %vm1757_vm8, %v2502_v51 }
 0xe1d   : > { %v2617_v52 = vpop.permute.xlu1 %2616 }
 0xe1e   : > { %2619 = vst.msk [vmem:[#allocation3] sm:$0xff] %vm1873_vm9, %v2617_v52 }
 0xe25   : > { %v2620_v54 = vld [vmem:[#allocation3] sm:$0xff] }
 0xe26   : > { %v2621_v55 = vpack.c.bf16 %v2620_v54, %v2620_v54 }
 0xe28   : > { %3582 = vmatmul.mubr.msk.bf16.vlgmr.msra.gmra.mrb[40].mxu1 %vm1247_vm4, %v2621_v55 }
 0xe29   : > { %3609 = vmatprep.mubr.msk.bf16.mxu1 %vm3861_vm3, %v3860_v26  ;;  %3594 = vmatpush3.bf16.msra.mxu1 %v3741_v16 }
 0xe2a   : > { %3595 = vmatprep.subr.bf16.mxu1 %v3860_v26 }
 0xe2d   : > { %3596 = vmatpush3.bf16.msra.mxu1 %v3742_v17 }
 0xe2e   : > { %3597 = vmatprep.subr.bf16.mxu1 %v3860_v26 }
 0xe31   : > { %3598 = vmatpush3.bf16.msra.mxu1 %v3743_v18 }
 0xe32   : > { %3599 = vmatprep.subr.bf16.mxu1 %v3860_v26 }
 0xe35   : > { %3600 = vmatpush3.bf16.msra.mxu1 %v3744_v20 }
 0xe36   : > { %3601 = vmatprep.subr.bf16.mxu1 %v3860_v26 }
 0xe39   : > { %3602 = vmatpush3.bf16.msra.mxu1 %v3745_v21 }
 0xe3a   : > { %3603 = vmatprep.subr.bf16.mxu1 %v3860_v26 }
 0xe3d   : > { %3604 = vmatpush3.bf16.msra.mxu1 %v3746_v22 }
 0xe3e   : > { %3605 = vmatprep.subr.bf16.mxu1 %v3860_v26 }
 0xe41   : > { %3606 = vmatpush3.bf16.msra.mxu1 %v3747_v23 }
 0xe42   : > { %3607 = vmatprep.subr.bf16.mxu1 %v3860_v26 }
 0xe45   : > { %3608 = vmatpush3.bf16.msra.mxu1 %v3748_v24 }
 0xefb   : > { %v2680_v57 = vpop.f32.mrb[40].mxu1 }
 0xefc   : > { %v2681_v14 = vadd.f32 %v3284_v56, %v2680_v57  ;;  %v3583_v58 = vpop.f32.mrb[41].mxu1  ;;  %v3294_v57 = vld [vmem:[%s4504_s18] ss:$0 sm:$0xff] }
 0xefd   : > { %v2683_v59 = vpop.f32.mrb[42].mxu1 }
 0xefe   : > { %v3584_v60 = vpop.f32.mrb[43].mxu1  ;;  %v2686_v61 = vadd.f32 %v2681_v14, %v4288_v53 }
 0xf00   : > { %v2689_v62 = vsel %vm1247_vm4, %v2686_v61, 0.0 }
 0xf01   : > { %2690 = vadd.xlane.f32.xlu0 %v2689_v62 }
 0xf8e   : > { %v2691_v63 = vpop.xlane.xlu0 %2690 }
 0xf8f   : > { %v2692_v0 = vmul.f32 0.03125, %v2691_v63 }
 0xf91   : > { %v2693_v1 = vsub.f32 %v2686_v61, %v2692_v0 }
 0xf93   : > { %v2694_v2 = vmul.f32 %v2693_v1, %v2693_v1 }
 0xf95   : > { %v2695_v3 = vsel %vm1247_vm4, %v2694_v2, 0.0 }
 0xf96   : > { %2696 = vadd.xlane.f32.xlu1 %v2695_v3 }
0x1023   : > { %v2697_v53 = vpop.xlane.xlu1 %2696 }
0x1024   : > { %v2698_v6 = vmul.f32 0.03125, %v2697_v53 }
0x1026   : > { %v2699_v7 = vadd.f32 1e-05, %v2698_v6 }
0x1028   : > { %3783 = vrsqrt.f32 %v2699_v7 }
0x1032   : > { %v3784_v8 = vpop.eup %3783 }
0x1033   : > { %v2701_v10 = vmul.f32 %v3784_v8, %v2693_v1  ;;  %v3303_v8 = vld [vmem:[%s4069_s1 + $0x4] ss:$0 sm:$0xff] }
0x1035   : > { %v2706_v12 = vmul.f32 %v3288_v9, %v2701_v10  ;;  %v3304_v10 = vld [vmem:[%s4069_s1 + $0x5] ss:$0 sm:$0xff]  ;;  %s4505_s1 = sld [smem:[#allocation20_spill]] (!%p3305_p5) }
0x1037   : > { %v4390_v13 = vadd.f32 %v3289_v11, %v2706_v12 }
0x1039   : > { %v2712_v15 = vpack.c.bf16 %v4390_v13, %v4390_v13 }
0x103b   : > { %3590 = vmatmul.mubr.msk.bf16.vlgmr.msra.gmra.mrb[52].mxu0 %vm1247_vm4, %v2712_v15  ;;  %v3868_v15 = vmov (!%p3305_p5), 0.0   ;;  %v3791_v17 = vld [vmem:[%s4505_s1] sm:$0xff] (!%p3305_p5)  }
0x103c   : > { %3613 = vmatprep.subr.bf16.mxu0 (!%p3305_p5), %v3868_v15  ;;  %3615 = vmatprep.mubr.msk.bf16.mxu0 (!%p3305_p5), %vm3869_vm11, %v3868_v15 }
0x110e   : > { %v2773_v27 = vpop.f32.mrb[52].mxu0 }
0x110f   : > { %v2774_v29 = vadd.f32 %v3290_v25, %v2773_v27  ;;  %v3591_v30 = vpop.f32.mrb[53].mxu0 }
0x1110   : > { %v2776_v31 = vpop.f32.mrb[54].mxu0 }
0x1111   : > { %v2779_v32 = vmul.f32 0.70710677, %v2774_v29  ;;  %v3592_v33 = vpop.f32.mrb[55].mxu0  ;;  %v2803_v52 = vmul.f32 0.5, %v2774_v29 }
0x1113   : > { %v2780_v34 = vand.u32 2147483647, %v2779_v32  ;;  %vm2800_vm10 = vcmp.ge.f32.partialorder %v2779_v32, 0.0 }
0x1115   : > { %v2781_v35 = vmul.f32 0.3275911, %v2780_v34  ;;  %v2794_v37 = vsub.f32 0.0, %v2780_v34 }
0x1117   : > { %v2782_v36 = vadd.f32 1.0, %v2781_v35  ;;  %v2795_v26 = vmul.f32 %v2794_v37, %v2780_v34 }
0x1119   : > { %3785 = vrcp.f32 %v2782_v36  ;;  %v2796_v41 = vmul.f32 1.442695, %v2795_v26 }
0x111b   : > { %3787 = vpow2.f32 %v2796_v41 }
0x1123   : > { %v3786_v38 = vpop.eup %3785 }
0x1124   : > { %v2785_v39 = vmul.f32 1.0614054, %v3786_v38 }
0x1125   : > { %v3788_v47 = vpop.eup %3787 }
0x1126   : > { %v2786_v40 = vadd.f32 -1.4531521, %v2785_v39 }
0x1128   : > { %v2787_v42 = vmul.f32 %v3786_v38, %v2786_v40 }
0x112a   : > { %v2788_v43 = vadd.f32 1.4214138, %v2787_v42 }
0x112c   : > { %v2789_v28 = vmul.f32 %v3786_v38, %v2788_v43 }
0x112e   : > { %v2790_v44 = vadd.f32 -0.28449672, %v2789_v28 }
0x1130   : > { %v2791_v45 = vmul.f32 %v3786_v38, %v2790_v44 }
0x1132   : > { %v2792_v19 = vadd.f32 0.2548296, %v2791_v45 }
0x1134   : > { %v2793_v46 = vmul.f32 %v3786_v38, %v2792_v19 }
0x1136   : > { %v2798_v48 = vmul.f32 %v3788_v47, %v2793_v46 }
0x1138   : > { %v2799_v49 = vsub.f32 1.0, %v2798_v48 }
0x113a   : > { %v2801_v50 = vsub.f32 0.0, %v2799_v49 }
0x113c   : > { %v2802_v51 = vsel %vm2800_vm10, %v2799_v49, %v2801_v50 }
0x113d   : > { %v2804_v54 = vadd.f32 1.0, %v2802_v51 }
0x113f   : > { %v2805_v55 = vmul.f32 %v2804_v54, %v2803_v52 }
0x1141   : > { %v2806_v56 = vpack.c.bf16 %v2805_v55, %v2805_v55 }
0x1143   : > { %3610 = vmatmul.mubr.bf16.vlgmr.msra.gmra.mrb[44].mxu1 %v2806_v56 }
0x1216   : > { %v2912_v14 = vpop.f32.mrb[44].mxu1 }
0x1217   : > { %v2913_v58 = vadd.f32 %v3294_v57, %v2912_v14  ;;  %v3611_v59 = vpop.f32.mrb[45].mxu1 }
0x1218   : > { %v2915_v60 = vpop.f32.mrb[46].mxu1 }
0x1219   : > { %v3612_v61 = vpop.f32.mrb[47].mxu1  ;;  %v2918_v62 = vadd.f32 %v2913_v58, %v4390_v13 }
0x121b   : > { %v2921_v63 = vsel %vm1247_vm4, %v2918_v62, 0.0 }
0x121c   : > { %2922 = vadd.xlane.f32.xlu0 %v2921_v63 }
0x12a9   : > { %v2923_v0 = vpop.xlane.xlu0 %2922 }
0x12aa   : > { %v2924_v1 = vmul.f32 0.03125, %v2923_v0 }
0x12ac   : > { %v2925_v2 = vsub.f32 %v2918_v62, %v2924_v1 }
0x12ae   : > { %v2926_v3 = vmul.f32 %v2925_v2, %v2925_v2 }
0x12b0   : > { %v2927_v4 = vsel %vm1247_vm4, %v2926_v3, 0.0 }
0x12b1   : > { %2928 = vadd.xlane.f32.xlu0 %v2927_v4 }
0x133e   : > { %v2929_v5 = vpop.xlane.xlu0 %2928 }
0x133f   : > { %v2930_v53 = vmul.f32 0.03125, %v2929_v5 }
0x1341   : > { %v2931_v6 = vadd.f32 1e-05, %v2930_v53 }
0x1343   : > { %3789 = vrsqrt.f32 %v2931_v6 }
0x134d   : > { %v3790_v7 = vpop.eup %3789 }
0x134e   : > { %v2933_v9 = vmul.f32 %v3790_v7, %v2925_v2  ;;  %2948 = sbr.rel (%p3305_p5) target bundleno = 5175 (0x1437), region = 96 }
0x1350   : > { %v2938_v11 = vmul.f32 %v3303_v8, %v2933_v9 }
0x1352   : > { %v2943_v12 = vadd.f32 %v3304_v10, %v2938_v11 }
0x1354   : > { %2944 = vst.msk [vmem:[#allocation2] sm:$0xff] %vm1247_vm4, %v2943_v12  ;;  %v2951_v13 = vpack.c.bf16 (!%p3305_p5), %v2943_v12, %v2943_v12 }
0x1356   : > { %v2961_v16 = vsel %vm1247_vm4, %v2951_v13, 0 }
0x1357   : > { %3614 = vmatpush3.bf16.xpose.msra.mxu0 %v2961_v16 }
0x135e   : > { %3616 = vmatmul.mubr.msk.bf16.vlgmr.msra.gmra.mrb[0].mxu0 %vm1247_vm4, %v3791_v17 }
0x1431   : > { %v2997_v18 = vpop.f32.mrb[0].mxu0 }
0x1432   : > { %v3004_v20 = vmul.f32 1.4142135, %v2997_v18  ;;  %v3617_v21 = vpop.f32.mrb[1].mxu0 }
0x1433   : > { %v3000_v22 = vpop.f32.mrb[2].mxu0 }
0x1434   : > { %3006 = vst.msk [vmem:[%s4075_s19] sm:$0xff] %vm1417_vm5, %v3004_v20  ;;  %v3005_v23 = vmul.f32 1.4142135, %v3000_v22  ;;  %v3618_v24 = vpop.f32.mrb[3].mxu0 }
0x1436   : > { %3007 = vst.msk [vmem:[%s4075_s19 + $0x8] sm:$0xff] %vm1417_vm5, %v3005_v23 }
0x1437 PF: > { %s4506_s21 = sld [smem:[#allocation10_spill]]  ;;  %s4508_s22 = sld [smem:[#allocation9_spill]] }
0x1438   : > { %s4509_s23 = sld [smem:[#allocation11_spill]]  ;;  %s4510_s24 = sld [smem:[#allocation12_spill]] }
0x143d   : > { %s27_s25 = sadd.s32 1, %s4506_s21   ;;  %s4507_s21 = sld [smem:[#allocation8_spill]] }
0x143e   : > { %p24_p6 = scmp.ge.s32.totalorder %s27_s25, 6  }
0x1440   :  { %26 = sbr.rel (!%p24_p6) target bundleno = 14 (0xe), region = 154 }
0x1447   :  { %3029 = vsyncpa [#allocation5], 1 }
0x1448   :  { %3031 = vsyncpa [#allocation5 + $0x1], 1 }

</bundles_post_ra>
